<compile_context>
chip_gen: v7x
topology: tpu7x:2x2x1
jax: 0.10.0
libtpu: 0.0.40
codegen_flags: <defaults>
</compile_context>

<pallas_src>
import jax
import jax.numpy as jnp
from jax.experimental import pallas as pl
from jax.experimental.pallas import tpu as pltpu

H1, H2, OUT = 100, 300, 28 * 28           # logical (PyTorch) feature sizes


def _round_up(x, m):
    return ((x + m - 1) // m) * m


H1_P, H2_P, OUT_P = _round_up(H1, 128), _round_up(H2, 128), _round_up(OUT, 128)


def decoder_kernel(z_ref, w1_ref, b1_ref, w2_ref, b2_ref, w3_ref, b3_ref, out_ref):
    # Layer 1: Linear(z_dim -> 100) + ReLU   (padded to 128 lanes)
    h1 = jnp.dot(z_ref[...], w1_ref[...], preferred_element_type=jnp.float32)
    h1 = jnp.maximum(h1 + b1_ref[...], 0.0)
    # Layer 2: Linear(100 -> 300) + ReLU     (padded to 384 lanes)
    h2 = jnp.dot(h1, w2_ref[...], preferred_element_type=jnp.float32)
    h2 = jnp.maximum(h2 + b2_ref[...], 0.0)
    # Layer 3: Linear(300 -> 784) + sigmoid  (padded to 896 lanes)
    h3 = jnp.dot(h2, w3_ref[...], preferred_element_type=jnp.float32)
    out_ref[...] = jax.nn.sigmoid(h3 + b3_ref[...])


def pad_params(params, z_dim):
    """Zero-pad weights/biases to lane-aligned (multiple-of-128) shapes."""
    zp = _round_up(z_dim, 128)

    def pad2(a, r, c):
        return jnp.pad(a, ((0, r - a.shape[0]), (0, c - a.shape[1])))

    return {
        "w1": pad2(params["w1"], zp, H1_P), "b1": pad2(params["b1"], 1, H1_P),
        "w2": pad2(params["w2"], H1_P, H2_P), "b2": pad2(params["b2"], 1, H2_P),
        "w3": pad2(params["w3"], H2_P, OUT_P), "b3": pad2(params["b3"], 1, OUT_P),
    }


def decoder_forward(z, padded_params, *, tb=256):
    """z: [B, z_dim] float32; padded_params: output of pad_params()."""
    B, z_dim = z.shape
    zp = _round_up(z_dim, 128)

    # Batch tile: fill the MXU M axis (up to 256) but don't blow up tiny batches.
    tb = min(tb, _round_up(B, 8))
    B_pad = _round_up(B, tb)

    # One-time zero pad of the activations (exact through the network).
    z_p = jnp.pad(z, ((0, B_pad - B), (0, zp - z_dim)))

    p = padded_params
    grid = (B_pad // tb,)

    # Weights/biases: index_map -> (0, 0) => DMA'd once, resident across tiles.
    resident = lambda shape: pl.BlockSpec(shape, lambda i: (0, 0))

    out_padded = pl.pallas_call(
        decoder_kernel,
        out_shape=jax.ShapeDtypeStruct((B_pad, OUT_P), jnp.float32),
        grid=grid,
        in_specs=[
            pl.BlockSpec((tb, zp), lambda i: (i, 0)),   # z tile (pipelined)
            resident((zp, H1_P)), resident((1, H1_P)),  # w1, b1
            resident((H1_P, H2_P)), resident((1, H2_P)),  # w2, b2
            resident((H2_P, OUT_P)), resident((1, OUT_P)),  # w3, b3
        ],
        out_specs=pl.BlockSpec((tb, OUT_P), lambda i: (i, 0)),
        compiler_params=pltpu.CompilerParams(
            dimension_semantics=("parallel",),   # megacore sharding on v7x
        ),
    )(z_p, p["w1"], p["b1"], p["w2"], p["b2"], p["w3"], p["b3"])

    return out_padded[:B, :OUT]


def init_params(key, z_dim):
    """Deterministic init mirroring nn.Linear. PyTorch weight is (out, in);
    we store the transpose (in, out) so the kernel does x @ W directly."""
    def linear(k, fan_in, fan_out):
        kw, kb = jax.random.split(k)
        bound = 1.0 / jnp.sqrt(fan_in)
        w = jax.random.uniform(kw, (fan_in, fan_out), jnp.float32, -bound, bound)
        b = jax.random.uniform(kb, (1, fan_out), jnp.float32, -bound, bound)
        return w, b

    k1, k2, k3 = jax.random.split(key, 3)
    w1, b1 = linear(k1, z_dim, H1)
    w2, b2 = linear(k2, H1, H2)
    w3, b3 = linear(k3, H2, OUT)
    return {"w1": w1, "b1": b1, "w2": w2, "b2": b2, "w3": w3, "b3": b3}


def reference_forward(z, params):
    h1 = jnp.maximum(z @ params["w1"] + params["b1"], 0.0)
    h2 = jnp.maximum(h1 @ params["w2"] + params["b2"], 0.0)
    return jax.nn.sigmoid(h2 @ params["w3"] + params["b3"])


if __name__ == "__main__":
    key = jax.random.PRNGKey(0)
    kz, kp = jax.random.split(key)

    batch, z_dim = 8, 16
    z = jax.random.normal(kz, (batch, z_dim), dtype=jnp.float32)
    params = init_params(kp, z_dim)
    padded = pad_params(params, z_dim)

    out = decoder_forward(z, padded)
    out = jax.block_until_ready(out)

    ref = reference_forward(z, params)
    assert out.shape == (batch, OUT)
    assert jnp.allclose(out, ref, atol=1e-5, rtol=1e-5)
    print("KERNEL_OK")
</pallas_src>

<mosaic_0001>
module attributes {stable_mosaic.version = 11 : i64} {
  func.func @decoder_kernel(%arg0: i32, %arg1: memref<8x128xf32, #tpu.memory_space<vmem>>, %arg2: memref<128x128xf32, #tpu.memory_space<vmem>>, %arg3: memref<1x128xf32, #tpu.memory_space<vmem>>, %arg4: memref<128x384xf32, #tpu.memory_space<vmem>>, %arg5: memref<1x384xf32, #tpu.memory_space<vmem>>, %arg6: memref<384x896xf32, #tpu.memory_space<vmem>>, %arg7: memref<1x896xf32, #tpu.memory_space<vmem>>, %arg8: memref<8x896xf32, #tpu.memory_space<vmem>>) attributes {dimension_semantics = [#tpu.dimension_semantics<parallel>], iteration_bounds = array<i64: 1>, scalar_prefetch = 0 : i64, scratch_operands = 0 : i64, tpu.core_type = #tpu.core_type<tc>, window_params = [{transform_indices = @transform_0, window_bounds = array<i64: 8, 128>}, {pipeline_mode = #tpu.pipeline_mode<synchronous>, transform_indices = @transform_1, window_bounds = array<i64: 128, 128>}, {pipeline_mode = #tpu.pipeline_mode<synchronous>, transform_indices = @transform_2, window_bounds = array<i64: 1, 128>}, {pipeline_mode = #tpu.pipeline_mode<synchronous>, transform_indices = @transform_3, window_bounds = array<i64: 128, 384>}, {pipeline_mode = #tpu.pipeline_mode<synchronous>, transform_indices = @transform_4, window_bounds = array<i64: 1, 384>}, {pipeline_mode = #tpu.pipeline_mode<synchronous>, transform_indices = @transform_5, window_bounds = array<i64: 384, 896>}, {pipeline_mode = #tpu.pipeline_mode<synchronous>, transform_indices = @transform_6, window_bounds = array<i64: 1, 896>}, {transform_indices = @transform_7, window_bounds = array<i64: 8, 896>}]} {
    %c0 = arith.constant 0 : index
    %c0_0 = arith.constant 0 : index
    %0 = vector.load %arg1[%c0, %c0_0] : memref<8x128xf32, #tpu.memory_space<vmem>>, vector<8x128xf32>
    %c0_1 = arith.constant 0 : index
    %c0_2 = arith.constant 0 : index
    %1 = vector.load %arg2[%c0_1, %c0_2] : memref<128x128xf32, #tpu.memory_space<vmem>>, vector<128x128xf32>
    %cst = arith.constant dense<0.000000e+00> : vector<8x128xf32>
    %2 = tpu.matmul %0, %1, %cst {dimension_numbers = #tpu.dot_dimension_numbers<[1], [0], [0], [1], [0, 0, 1, 1], [], []>} : vector<8x128xf32>, vector<128x128xf32>, vector<8x128xf32> -> vector<8x128xf32>
    %c0_3 = arith.constant 0 : index
    %c0_4 = arith.constant 0 : index
    %3 = vector.load %arg3[%c0_3, %c0_4] : memref<1x128xf32, #tpu.memory_space<vmem>>, vector<1x128xf32>
    %4 = vector.broadcast %3 : vector<1x128xf32> to vector<8x128xf32>
    %5 = arith.addf %2, %4 : vector<8x128xf32>
    %cst_5 = arith.constant 0.000000e+00 : f32
    %6 = vector.broadcast %cst_5 : f32 to vector<8x128xf32>
    %7 = arith.maximumf %5, %6 : vector<8x128xf32>
    %c0_6 = arith.constant 0 : index
    %c0_7 = arith.constant 0 : index
    %8 = vector.load %arg4[%c0_6, %c0_7] : memref<128x384xf32, #tpu.memory_space<vmem>>, vector<128x384xf32>
    %cst_8 = arith.constant dense<0.000000e+00> : vector<8x384xf32>
    %9 = tpu.matmul %7, %8, %cst_8 {dimension_numbers = #tpu.dot_dimension_numbers<[1], [0], [0], [1], [0, 0, 1, 1], [], []>} : vector<8x128xf32>, vector<128x384xf32>, vector<8x384xf32> -> vector<8x384xf32>
    %c0_9 = arith.constant 0 : index
    %c0_10 = arith.constant 0 : index
    %10 = vector.load %arg5[%c0_9, %c0_10] : memref<1x384xf32, #tpu.memory_space<vmem>>, vector<1x384xf32>
    %11 = vector.broadcast %10 : vector<1x384xf32> to vector<8x384xf32>
    %12 = arith.addf %9, %11 : vector<8x384xf32>
    %cst_11 = arith.constant 0.000000e+00 : f32
    %13 = vector.broadcast %cst_11 : f32 to vector<8x384xf32>
    %14 = arith.maximumf %12, %13 : vector<8x384xf32>
    %c0_12 = arith.constant 0 : index
    %c0_13 = arith.constant 0 : index
    %15 = vector.load %arg6[%c0_12, %c0_13] : memref<384x896xf32, #tpu.memory_space<vmem>>, vector<384x896xf32>
    %cst_14 = arith.constant dense<0.000000e+00> : vector<8x896xf32>
    %16 = tpu.matmul %14, %15, %cst_14 {dimension_numbers = #tpu.dot_dimension_numbers<[1], [0], [0], [1], [0, 0, 1, 1], [], []>} : vector<8x384xf32>, vector<384x896xf32>, vector<8x896xf32> -> vector<8x896xf32>
    %c0_15 = arith.constant 0 : index
    %c0_16 = arith.constant 0 : index
    %17 = vector.load %arg7[%c0_15, %c0_16] : memref<1x896xf32, #tpu.memory_space<vmem>>, vector<1x896xf32>
    %18 = vector.broadcast %17 : vector<1x896xf32> to vector<8x896xf32>
    %19 = arith.addf %16, %18 : vector<8x896xf32>
    %20 = arith.negf %19 : vector<8x896xf32>
    %21 = math.exp %20 : vector<8x896xf32>
    %cst_17 = arith.constant 1.000000e+00 : f32
    %22 = vector.broadcast %cst_17 : f32 to vector<8x896xf32>
    %23 = arith.addf %22, %21 : vector<8x896xf32>
    %24 = arith.divf %22, %23 : vector<8x896xf32>
    %c0_18 = arith.constant 0 : index
    %c0_19 = arith.constant 0 : index
    %25 = vector.load %arg8[%c0_18, %c0_19] : memref<8x896xf32, #tpu.memory_space<vmem>>, vector<8x896xf32>
    tpu.vector_store %arg8[%c0_18, %c0_19], %24 {strides = array<i32>} : memref<8x896xf32, #tpu.memory_space<vmem>>, vector<8x896xf32>,
    return
  }
  func.func @transform_0(%arg0: i32) -> (i32, i32) {
    %c0_i32 = arith.constant 0 : i32
    %c0_i32_0 = arith.constant 0 : i32
    return %arg0, %c0_i32 : i32, i32
  }
  func.func @transform_1(%arg0: i32) -> (i32, i32) {
    %c0_i32 = arith.constant 0 : i32
    %c0_i32_0 = arith.constant 0 : i32
    %c0_i32_1 = arith.constant 0 : i32
    return %c0_i32, %c0_i32_0 : i32, i32
  }
  func.func @transform_2(%arg0: i32) -> (i32, i32) {
    %c0_i32 = arith.constant 0 : i32
    %c0_i32_0 = arith.constant 0 : i32
    %c0_i32_1 = arith.constant 0 : i32
    return %c0_i32, %c0_i32_0 : i32, i32
  }
  func.func @transform_3(%arg0: i32) -> (i32, i32) {
    %c0_i32 = arith.constant 0 : i32
    %c0_i32_0 = arith.constant 0 : i32
    %c0_i32_1 = arith.constant 0 : i32
    return %c0_i32, %c0_i32_0 : i32, i32
  }
  func.func @transform_4(%arg0: i32) -> (i32, i32) {
    %c0_i32 = arith.constant 0 : i32
    %c0_i32_0 = arith.constant 0 : i32
    %c0_i32_1 = arith.constant 0 : i32
    return %c0_i32, %c0_i32_0 : i32, i32
  }
  func.func @transform_5(%arg0: i32) -> (i32, i32) {
    %c0_i32 = arith.constant 0 : i32
    %c0_i32_0 = arith.constant 0 : i32
    %c0_i32_1 = arith.constant 0 : i32
    return %c0_i32, %c0_i32_0 : i32, i32
  }
  func.func @transform_6(%arg0: i32) -> (i32, i32) {
    %c0_i32 = arith.constant 0 : i32
    %c0_i32_0 = arith.constant 0 : i32
    %c0_i32_1 = arith.constant 0 : i32
    return %c0_i32, %c0_i32_0 : i32, i32
  }
  func.func @transform_7(%arg0: i32) -> (i32, i32) {
    %c0_i32 = arith.constant 0 : i32
    %c0_i32_0 = arith.constant 0 : i32
    return %arg0, %c0_i32 : i32, i32
  }
}

</mosaic_0001>

<bundles_post_ra>
// kernel: tpu_custom_call.1
= control target key start
LH: loop header
LB: loop body
LE: loop exit
PB: predicated region body
PF: predicated region fallthrough
CT: control target
= control target key end

     0   :  { %12 = vsyncpa [#allocation3], 0  ;;  %s2524_s0 = inlined_call_operand.hbm [shape: f32[8,128], index: 0, kind: input, shape index: {}]   ;;  %s2525_s1 = inlined_call_operand.hbm [shape: f32[128,128], index: 1, kind: input, shape index: {}]   ;;  %s2526_s2 = inlined_call_operand.hbm [shape: f32[1,128], index: 2, kind: input, shape index: {}]   ;;  %s2527_s3 = inlined_call_operand.hbm [shape: f32[128,384], index: 3, kind: input, shape index: {}]   ;;  %s2528_s4 = inlined_call_operand.hbm [shape: f32[1,384], index: 4, kind: input, shape index: {}]   ;;  %s2529_s5 = inlined_call_operand.hbm [shape: f32[384,896], index: 5, kind: input, shape index: {}]   ;;  %s2530_s6 = inlined_call_operand.hbm [shape: f32[1,896], index: 6, kind: input, shape index: {}]   ;;  %s2531_s7 = inlined_call_operand.hbm [shape: f32[8,896], index: 7, kind: output, shape index: {}]  }
   0x1   :  { %13 = vsyncpa [#allocation6], 0 }
   0x2   :  { %14 = vsyncpa [#allocation9], 0 }
   0x3   :  { %15 = vsyncpa [#allocation12], 0 }
   0x4   :  { %16 = vsyncpa [#allocation4], 0  ;;  %s2290_s24 = smov [#allocation5]   ;;  %s2104_s28 = scalar_lea.hbm %s2525_s1, 2048 }
   0x5   :  { %s32_s25 = sshll.u32 %s2290_s24, 4  ;;  %p2105_p0 = scmp.ne.s32.totalorder %s2525_s1, %s2104_s28  ;;  %s33_s25 = int_to_ptr.vmem [resolvable:$true] %s32_s25 }
   0x6   :  { %p2108_p1 = scmp.lt.u32.totalorder %s2104_s28, %s2525_s1 }
   0x8   :  { %p2110_p2 = pnand %p2108_p1, %p2105_p0 }
   0xa   :  { %2113 = shalt.err (!%p2110_p2)
}
   0xb   :  { %s2114_s10 = scalar_lea.vmem %s33_s25, 2048  ;;  %p2119_p4 = scmp.lt.s32.totalorder %s33_s25, %s33_s25 }
   0xc   :  { %p2115_p3 = scmp.ne.s32.totalorder %s33_s25, %s2114_s10  ;;  %p2120_p5 = scmp.lt.s32.totalorder %s2114_s10, %s2114_s10 }
   0xe   :  { %p2121_p6 = por %p2120_p5, %p2119_p4 }
  0x10   :  { %p2122_p7 = pnand %p2121_p6, %p2115_p3 }
  0x12   :  { %2125 = shalt.err (!%p2122_p7)
}
  0x13   :  { %s2291_s11 = smov 128   ;;  %s2292_s12 = smov 8  }
  0x14   :  { %38 = dma.hbm_to_vmem [thread:$0]  %s2525_s1, 2048, %s33_s25, [#allocation6], %s2291_s11, %s2291_s11, %s2292_s12  }
  0x15   :  { %s2293_s15 = smov [#allocation8]   ;;  %s2126_s19 = scalar_lea.hbm %s2527_s3, 6144 }
  0x16   :  { %s54_s16 = sshll.u32 %s2293_s15, 4  ;;  %p2127_p8 = scmp.ne.s32.totalorder %s2527_s3, %s2126_s19  ;;  %s55_s16 = int_to_ptr.vmem [resolvable:$true] %s54_s16 }
  0x17   :  { %p2130_p9 = scmp.lt.u32.totalorder %s2126_s19, %s2527_s3 }
  0x19   :  { %p2132_p10 = pnand %p2130_p9, %p2127_p8 }
  0x1b   :  { %2135 = shalt.err (!%p2132_p10)
}
  0x1c   :  { %s2136_s24 = scalar_lea.vmem %s55_s16, 6144  ;;  %p2141_p12 = scmp.lt.s32.totalorder %s55_s16, %s55_s16 }
  0x1d   :  { %p2137_p11 = scmp.ne.s32.totalorder %s55_s16, %s2136_s24  ;;  %p2142_p13 = scmp.lt.s32.totalorder %s2136_s24, %s2136_s24 }
  0x1f   :  { %p2143_p0 = por %p2142_p13, %p2141_p12 }
  0x21   :  { %p2144_p1 = pnand %p2143_p0, %p2137_p11 }
  0x23   :  { %2147 = shalt.err (!%p2144_p1)
}
  0x24   :  { %s2294_s1 = smov 384   ;;  %s2295_s25 = smov 24  }
  0x25   :  { %60 = dma.hbm_to_vmem [thread:$0]  %s2527_s3, 6144, %s55_s16, [#allocation9], %s2294_s1, %s2294_s1, %s2295_s25  }
  0x26   :  { %s2296_s28 = smov [#allocation11]   ;;  %s2148_s9 = scalar_lea.hbm %s2529_s5, 43008 }
  0x27   :  { %s76_s29 = sshll.u32 %s2296_s28, 4  ;;  %p2149_p2 = scmp.ne.s32.totalorder %s2529_s5, %s2148_s9  ;;  %s77_s29 = int_to_ptr.vmem [resolvable:$true] %s76_s29 }
  0x28   :  { %p2152_p3 = scmp.lt.u32.totalorder %s2148_s9, %s2529_s5 }
  0x2a   :  { %p2154_p4 = pnand %p2152_p3, %p2149_p2 }
  0x2c   :  { %2157 = shalt.err (!%p2154_p4)
}
  0x2d   :  { %s2158_s14 = scalar_lea.vmem %s77_s29, 43008  ;;  %p2163_p6 = scmp.lt.s32.totalorder %s77_s29, %s77_s29 }
  0x2e   :  { %p2159_p5 = scmp.ne.s32.totalorder %s77_s29, %s2158_s14  ;;  %p2164_p7 = scmp.lt.s32.totalorder %s2158_s14, %s2158_s14 }
  0x30   :  { %p2165_p8 = por %p2164_p7, %p2163_p6 }
  0x32   :  { %p2166_p9 = pnand %p2165_p8, %p2159_p5 }
  0x34   :  { %2169 = shalt.err (!%p2166_p9)
}
  0x35   :  { %s2297_s3 = smov 896   ;;  %s2298_s15 = smov 56  }
  0x36   :  { %82 = dma.hbm_to_vmem [thread:$0]  %s2529_s5, 43008, %s77_s29, [#allocation12], %s2297_s3, %s2297_s3, %s2298_s15  }
  0x37   :  { %s2299_s18 = smov [#allocation2]   ;;  %s2300_s20 = smov [#allocation7]  }
  0x38   :  { %s23_s19 = sshll.u32 %s2299_s18, 4  ;;  %s45_s21 = sshll.u32 %s2300_s20, 4  ;;  %s24_s19 = int_to_ptr.vmem [resolvable:$true] %s23_s19  ;;  %s46_s21 = int_to_ptr.vmem [resolvable:$true] %s45_s21 }
  0x39   :  { %s2170_s24 = scalar_lea.hbm %s2524_s0, 128 }
  0x3a   :  { %p2171_p10 = scmp.ne.s32.totalorder %s2524_s0, %s2170_s24  ;;  %p2174_p11 = scmp.lt.u32.totalorder %s2170_s24, %s2524_s0 }
  0x3c   :  { %p2176_p12 = pnand %p2174_p11, %p2171_p10 }
  0x3e   :  { %2179 = shalt.err (!%p2176_p12)
}
  0x3f   :  { %s2180_s5 = scalar_lea.vmem %s24_s19, 128  ;;  %p2185_p0 = scmp.lt.s32.totalorder %s24_s19, %s24_s19 }
  0x40   :  { %p2181_p13 = scmp.ne.s32.totalorder %s24_s19, %s2180_s5  ;;  %p2186_p1 = scmp.lt.s32.totalorder %s2180_s5, %s2180_s5 }
  0x42   :  { %p2187_p2 = por %p2186_p1, %p2185_p0 }
  0x44   :  { %p2188_p3 = pnand %p2187_p2, %p2181_p13 }
  0x46   :  { %2191 = shalt.err (!%p2188_p3)
}
  0x47   :  { %26 = dma.hbm_to_vmem [thread:$0]  %s2524_s0, 128, %s24_s19, [#allocation3]  }
  0x48   :  { %s2192_s9 = scalar_lea.hbm %s2526_s2, 16 }
  0x49   :  { %p2193_p4 = scmp.ne.s32.totalorder %s2526_s2, %s2192_s9  ;;  %p2196_p5 = scmp.lt.u32.totalorder %s2192_s9, %s2526_s2 }
  0x4b   :  { %p2198_p6 = pnand %p2196_p5, %p2193_p4 }
  0x4d   :  { %2201 = shalt.err (!%p2198_p6)
}
  0x4e   :  { %s2202_s14 = scalar_lea.vmem %s46_s21, 16  ;;  %s2206_s3 = scalar_lea.vmem %s46_s21, 32 }
  0x4f   :  { %p2203_p7 = scmp.ne.s32.totalorder %s46_s21, %s2202_s14  ;;  %p2207_p8 = scmp.lt.s32.totalorder %s46_s21, %s46_s21 }
  0x50   :  { %p2208_p9 = scmp.lt.s32.totalorder %s2206_s3, %s2202_s14 }
  0x52   :  { %p2209_p10 = por %p2208_p9, %p2207_p8 }
  0x54   :  { %p2210_p11 = pnand %p2209_p10, %p2203_p7 }
  0x56   :  { %2213 = shalt.err (!%p2210_p11)
}
  0x57   :  { %48 = dma.hbm_to_vmem [thread:$0]  %s2526_s2, 16, %s46_s21, [#allocation6]  }
  0x58   :  { %s2301_s16 = smov [#allocation10]   ;;  %s2302_s18 = smov [#allocation13]  }
  0x59   :  { %s67_s17 = sshll.u32 %s2301_s16, 4  ;;  %s89_s19 = sshll.u32 %s2302_s18, 4  ;;  %s68_s17 = int_to_ptr.vmem [resolvable:$true] %s67_s17  ;;  %s90_s19 = int_to_ptr.vmem [resolvable:$true] %s89_s19 }
  0x5a   :  { %s2214_s23 = scalar_lea.hbm %s2528_s4, 48 }
  0x5b   :  { %p2215_p12 = scmp.ne.s32.totalorder %s2528_s4, %s2214_s23  ;;  %p2218_p13 = scmp.lt.u32.totalorder %s2214_s23, %s2528_s4 }
  0x5d   :  { %p2220_p0 = pnand %p2218_p13, %p2215_p12 }
  0x5f   :  { %2223 = shalt.err (!%p2220_p0)
}
  0x60   :  { %s2224_s2 = scalar_lea.vmem %s68_s17, 48  ;;  %s2228_s21 = scalar_lea.vmem %s68_s17, 64 }
  0x61   :  { %p2225_p1 = scmp.ne.s32.totalorder %s68_s17, %s2224_s2  ;;  %p2229_p2 = scmp.lt.s32.totalorder %s68_s17, %s68_s17 }
  0x62   :  { %p2230_p3 = scmp.lt.s32.totalorder %s2228_s21, %s2224_s2 }
  0x64   :  { %p2231_p4 = por %p2230_p3, %p2229_p2 }
  0x66   :  { %p2232_p5 = pnand %p2231_p4, %p2225_p1 }
  0x68   :  { %2235 = shalt.err (!%p2232_p5)
}
  0x69   :  { %70 = dma.hbm_to_vmem [thread:$0]  %s2528_s4, 48, %s68_s17, [#allocation9]  }
  0x6a   :  { %s2236_s30 = scalar_lea.hbm %s2530_s6, 112 }
  0x6b   :  { %p2237_p6 = scmp.ne.s32.totalorder %s2530_s6, %s2236_s30  ;;  %p2240_p7 = scmp.lt.u32.totalorder %s2236_s30, %s2530_s6 }
  0x6d   :  { %p2242_p8 = pnand %p2240_p7, %p2237_p6 }
  0x6f   :  { %2245 = shalt.err (!%p2242_p8)
}
  0x70   :  { %s2246_s12 = scalar_lea.vmem %s90_s19, 112  ;;  %s2250_s13 = scalar_lea.vmem %s90_s19, 128 }
  0x71   :  { %p2247_p9 = scmp.ne.s32.totalorder %s90_s19, %s2246_s12  ;;  %p2251_p10 = scmp.lt.s32.totalorder %s90_s19, %s90_s19 }
  0x72   :  { %p2252_p11 = scmp.lt.s32.totalorder %s2250_s13, %s2246_s12 }
  0x74   :  { %p2253_p12 = por %p2252_p11, %p2251_p10 }
  0x76   :  { %p2254_p13 = pnand %p2253_p12, %p2247_p9 }
  0x78   :  { %2257 = shalt.err (!%p2254_p13)
}
  0x79   :  { %92 = dma.hbm_to_vmem [thread:$0]  %s2530_s6, 112, %s90_s19, [#allocation12]  }
  0x7a   :  { %2280 = dma.done.wait [#allocation3], 128  }
  0x7b   :  { %2281 = vsyncadd [#allocation3], 4294967168 }
  0x7c   :  { %2282 = dma.done.wait [#allocation6], 2064  }
  0x7d   :  { %2283 = vsyncadd [#allocation6], 4294965232 }
  0x7e   :  { %2284 = dma.done.wait [#allocation9], 6192  }
  0x7f   :  { %2285 = vsyncadd [#allocation9], 4294961104 }
  0x80   :  { %2286 = dma.done.wait [#allocation12], 43120  }
  0x81   :  { %2287 = vsyncadd [#allocation12], 4294924176  ;;  %v2303_v0 = vmov 0.0|0.0   ;;  %vm2304_vm0 = vmmov 0   ;;  %v2305_v1 = vmov 0.0   ;;  %v115_v2 = vld [vmem:[#allocation5] sm:$0xff] }
  0x82   :  { %1623 = vmatprep.subr.bf16.mxu0 %v2303_v0  ;;  %1550 = vmatprep.mubr.msk.f32.mxu0 %vm2304_vm0, %v2305_v1  ;;  %v116_v3 = vld [vmem:[#allocation5 + $0x8] sm:$0xff]  ;;  %v117_v4 = vld [vmem:[#allocation5 + $0x10] sm:$0xff]  ;;  %v118_v6 = vld [vmem:[#allocation5 + $0x18] sm:$0xff]  ;;  %s2306_s6 = smov [#allocation14]  }
  0x83   :  { %338 = vmatprep.mubr.f32.mxu1 %v2305_v1  ;;  %v1624_v5 = vpack.c.bf16 %v116_v3, %v115_v2  ;;  %v1627_v7 = vpack.c.bf16 %v118_v6, %v117_v4  ;;  %v119_v8 = vld [vmem:[#allocation5 + $0x20] sm:$0xff]  ;;  %v120_v9 = vld [vmem:[#allocation5 + $0x28] sm:$0xff]  ;;  %v121_v15 = vld [vmem:[#allocation5 + $0x30] sm:$0xff]  ;;  %s1412_s3 = sshll.u32 %s2306_s6, 4  ;;  %s1413_s3 = int_to_ptr.vmem [resolvable:$true] %s1412_s3 }
  0x84   :  { %v210_v10 = vld [vmem:[#allocation8 + $0x8] sm:$0xff]  ;;  %v213_v11 = vld [vmem:[#allocation8 + $0x20] sm:$0xff]  ;;  %v212_v13 = vld [vmem:[#allocation8 + $0x18] sm:$0xff]  ;;  %v1630_v14 = vpack.c.bf16 %v120_v9, %v119_v8  ;;  %s2258_s0 = scalar_lea.vmem %s1413_s3, 896  ;;  %p2263_p1 = scmp.lt.s32.totalorder %s1413_s3, %s1413_s3 }
  0x85   :  { %1625 = vmatpush3.bf16.msra.mxu0 %v1624_v5  ;;  %v209_v12 = vld [vmem:[#allocation8] sm:$0xff]  ;;  %v122_v16 = vld [vmem:[#allocation5 + $0x38] sm:$0xff]  ;;  %v1647_v17 = vpack.c.bf16 %v213_v11, %v210_v10  ;;  %v218_v22 = vld [vmem:[#allocation8 + $0x48] sm:$0xff]  ;;  %p2259_p0 = scmp.ne.s32.totalorder %s1413_s3, %s2258_s0  ;;  %p2264_p2 = scmp.lt.s32.totalorder %s2258_s0, %s2258_s0 }
  0x86   :  { %1626 = vmatprep.subr.bf16.mxu0 %v2303_v0  ;;  %v1649_v18 = vpack.c.bf16 %v212_v13, %v209_v12  ;;  %v216_v19 = vld [vmem:[#allocation8 + $0x38] sm:$0xff]  ;;  %v219_v20 = vld [vmem:[#allocation8 + $0x50] sm:$0xff]  ;;  %v222_v24 = vld [vmem:[#allocation8 + $0x68] sm:$0xff]  ;;  %v1633_v27 = vpack.c.bf16 %v122_v16, %v121_v15 }
  0x87   :  { %v215_v21 = vld [vmem:[#allocation8 + $0x30] sm:$0xff]  ;;  %1648 = vmatprep.subr.bf16.mxu1 %v1647_v17  ;;  %v1651_v23 = vpack.c.bf16 %v219_v20, %v216_v19  ;;  %v225_v26 = vld [vmem:[#allocation8 + $0x80] sm:$0xff]  ;;  %v224_v31 = vld [vmem:[#allocation8 + $0x78] sm:$0xff]  ;;  %p2265_p3 = por %p2264_p2, %p2263_p1 }
  0x88   :  { %1650 = vmatpush1.bf16.msra.mxu1 %v1649_v18  ;;  %v1653_v25 = vpack.c.bf16 %v218_v22, %v215_v21  ;;  %v123_v28 = vld [vmem:[#allocation5 + $0x40] sm:$0xff]  ;;  %v1655_v29 = vpack.c.bf16 %v225_v26, %v222_v24  ;;  %v124_v32 = vld [vmem:[#allocation5 + $0x48] sm:$0xff]  ;;  %v231_v34 = vld [vmem:[#allocation8 + $0xb0] sm:$0xff] }
  0x89   :  { %1628 = vmatpush3.bf16.msra.mxu0 %v1627_v7  ;;  %1652 = vmatprep.subr.bf16.mxu1 %v1651_v23  ;;  %v221_v30 = vld [vmem:[#allocation8 + $0x60] sm:$0xff]  ;;  %v228_v33 = vld [vmem:[#allocation8 + $0x98] sm:$0xff]  ;;  %v1636_v36 = vpack.c.bf16 %v124_v32, %v123_v28  ;;  %v125_v37 = vld [vmem:[#allocation5 + $0x50] sm:$0xff]  ;;  %p2266_p4 = pnand %p2265_p3, %p2259_p0 }
  0x8a   :  { %1629 = vmatprep.subr.bf16.mxu0 %v2303_v0  ;;  %v1657_v35 = vpack.c.bf16 %v224_v31, %v221_v30  ;;  %v1659_v38 = vpack.c.bf16 %v231_v34, %v228_v33  ;;  %v227_v39 = vld [vmem:[#allocation8 + $0x90] sm:$0xff]  ;;  %v230_v40 = vld [vmem:[#allocation8 + $0xa8] sm:$0xff]  ;;  %v237_v43 = vld [vmem:[#allocation8 + $0xe0] sm:$0xff] }
  0x8b   :  { %v126_v41 = vld [vmem:[#allocation5 + $0x58] sm:$0xff]  ;;  %v234_v42 = vld [vmem:[#allocation8 + $0xc8] sm:$0xff]  ;;  %v1661_v44 = vpack.c.bf16 %v230_v40, %v227_v39  ;;  %v127_v46 = vld [vmem:[#allocation5 + $0x60] sm:$0xff] }
  0x8c   :  { %1654 = vmatpush1.bf16.msra.mxu1 %v1653_v25  ;;  %v1639_v45 = vpack.c.bf16 %v126_v41, %v125_v37  ;;  %v1663_v47 = vpack.c.bf16 %v237_v43, %v234_v42  ;;  %v233_v48 = vld [vmem:[#allocation8 + $0xc0] sm:$0xff]  ;;  %v236_v49 = vld [vmem:[#allocation8 + $0xd8] sm:$0xff]  ;;  %v243_v52 = vld [vmem:[#allocation8 + $0x110] sm:$0xff] }
  0x8d   :  { %1631 = vmatpush3.bf16.msra.mxu0 %v1630_v14  ;;  %1656 = vmatprep.subr.bf16.mxu1 %v1655_v29  ;;  %v128_v50 = vld [vmem:[#allocation5 + $0x68] sm:$0xff]  ;;  %v240_v51 = vld [vmem:[#allocation8 + $0xf8] sm:$0xff]  ;;  %v1665_v53 = vpack.c.bf16 %v236_v49, %v233_v48  ;;  %v129_v55 = vld [vmem:[#allocation5 + $0x70] sm:$0xff] }
  0x8e   :  { %1632 = vmatprep.subr.bf16.mxu0 %v2303_v0  ;;  %v1642_v54 = vpack.c.bf16 %v128_v50, %v127_v46  ;;  %v1667_v56 = vpack.c.bf16 %v243_v52, %v240_v51  ;;  %v239_v57 = vld [vmem:[#allocation8 + $0xf0] sm:$0xff]  ;;  %v242_v58 = vld [vmem:[#allocation8 + $0x108] sm:$0xff]  ;;  %v249_v61 = vld [vmem:[#allocation8 + $0x140] sm:$0xff] }
  0x8f   :  { %v130_v59 = vld [vmem:[#allocation5 + $0x78] sm:$0xff]  ;;  %v246_v60 = vld [vmem:[#allocation8 + $0x128] sm:$0xff]  ;;  %v1669_v62 = vpack.c.bf16 %v242_v58, %v239_v57  ;;  %v245_v3 = vld [vmem:[#allocation8 + $0x120] sm:$0xff] }
  0x90   :  { %1658 = vmatpush1.bf16.msra.mxu1 %v1657_v35  ;;  %v1645_v63 = vpack.c.bf16 %v130_v59, %v129_v55  ;;  %v1671_v2 = vpack.c.bf16 %v249_v61, %v246_v60  ;;  %v248_v4 = vld [vmem:[#allocation8 + $0x138] sm:$0xff]  ;;  %v211_v5 = vld [vmem:[#allocation8 + $0x10] sm:$0xff]  ;;  %v214_v6 = vld [vmem:[#allocation8 + $0x28] sm:$0xff] }
  0x91   :  { %1634 = vmatpush3.bf16.msra.mxu0 %v1633_v27  ;;  %1660 = vmatprep.subr.bf16.mxu1 %v1659_v38  ;;  %v1673_v7 = vpack.c.bf16 %v248_v4, %v245_v3  ;;  %v114_v8 = vld [vmem:[#allocation2] sm:$0xff]  ;;  %v1680_v9 = vpack.c.bf16 %v214_v6, %v211_v5  ;;  %v217_v10 = vld [vmem:[#allocation8 + $0x40] sm:$0xff]  ;;  %v226_v14 = vld [vmem:[#allocation8 + $0x88] sm:$0xff] }
  0x92   :  { %1635 = vmatprep.subr.bf16.mxu0 %v2303_v0  ;;  %v220_v11 = vld [vmem:[#allocation8 + $0x58] sm:$0xff]  ;;  %v223_v13 = vld [vmem:[#allocation8 + $0x70] sm:$0xff]  ;;  %v229_v16 = vld [vmem:[#allocation8 + $0xa0] sm:$0xff] }
  0x93   :  { %v1683_v12 = vpack.c.bf16 %v220_v11, %v217_v10  ;;  %v1686_v15 = vpack.c.bf16 %v226_v14, %v223_v13  ;;  %v232_v17 = vld [vmem:[#allocation8 + $0xb8] sm:$0xff]  ;;  %v235_v19 = vld [vmem:[#allocation8 + $0xd0] sm:$0xff]  ;;  %v238_v20 = vld [vmem:[#allocation8 + $0xe8] sm:$0xff] }
  0x94   :  { %1662 = vmatpush1.bf16.msra.mxu1 %v1661_v44  ;;  %v1689_v18 = vpack.c.bf16 %v232_v17, %v229_v16  ;;  %v1692_v21 = vpack.c.bf16 %v238_v20, %v235_v19  ;;  %v241_v22 = vld [vmem:[#allocation8 + $0x100] sm:$0xff]  ;;  %v244_v23 = vld [vmem:[#allocation8 + $0x118] sm:$0xff]  ;;  %v247_v25 = vld [vmem:[#allocation8 + $0x130] sm:$0xff] }
  0x95   :  { %1637 = vmatpush3.bf16.msra.mxu0 %v1636_v36  ;;  %1664 = vmatprep.subr.bf16.mxu1 %v1663_v47  ;;  %v1695_v24 = vpack.c.bf16 %v244_v23, %v241_v22  ;;  %v250_v26 = vld [vmem:[#allocation8 + $0x148] sm:$0xff]  ;;  %v252_v28 = vld [vmem:[#allocation8 + $0x158] sm:$0xff]  ;;  %v255_v29 = vld [vmem:[#allocation8 + $0x170] sm:$0xff] }
  0x96   :  { %1638 = vmatprep.subr.bf16.mxu0 %v2303_v0  ;;  %v1698_v27 = vpack.c.bf16 %v250_v26, %v247_v25  ;;  %v1675_v30 = vpack.c.bf16 %v255_v29, %v252_v28  ;;  %v251_v31 = vld [vmem:[#allocation8 + $0x150] sm:$0xff]  ;;  %v254_v32 = vld [vmem:[#allocation8 + $0x168] sm:$0xff]  ;;  %v253_v33 = vld [vmem:[#allocation8 + $0x160] sm:$0xff] }
  0x97   :  { %v1677_v34 = vpack.c.bf16 %v254_v32, %v251_v31  ;;  %v256_v35 = vld [vmem:[#allocation8 + $0x178] sm:$0xff]  ;;  %v419_v37 = vld [vmem:[#allocation11 + $0x8] sm:$0xff]  ;;  %v426_v38 = vld [vmem:[#allocation11 + $0x40] sm:$0xff] }
  0x98   :  { %1666 = vmatpush1.bf16.msra.mxu1 %v1665_v53  ;;  %v1701_v36 = vpack.c.bf16 %v256_v35, %v253_v33  ;;  %v421_v39 = vld [vmem:[#allocation11 + $0x18] sm:$0xff]  ;;  %v1703_v40 = vpack.c.bf16 %v426_v38, %v419_v37  ;;  %v428_v41 = vld [vmem:[#allocation11 + $0x50] sm:$0xff]  ;;  %v418_v44 = vld [vmem:[#allocation11] sm:$0xff] }
  0x99   :  { %1640 = vmatpush3.bf16.msra.mxu0 %v1639_v45  ;;  %1668 = vmatprep.subr.bf16.mxu1 %v1667_v56  ;;  %v1799_v42 = vpack.c.bf16 %v428_v41, %v421_v39  ;;  %v1424_v43 = vld [vmem:[#allocation7] ss:$0 sm:$0xff]  ;;  %v420_v46 = vld [vmem:[#allocation11 + $0x10] sm:$0xff]  ;;  %v427_v47 = vld [vmem:[#allocation11 + $0x48] sm:$0xff] }
  0x9a   :  { %1641 = vmatprep.subr.bf16.mxu0 %v2303_v0  ;;  %v425_v45 = vld [vmem:[#allocation11 + $0x38] sm:$0xff]  ;;  %v440_v50 = vld [vmem:[#allocation11 + $0xb0] sm:$0xff]  ;;  %v435_v51 = vld [vmem:[#allocation11 + $0x88] sm:$0xff]  ;;  %v1801_v56 = vpack.c.bf16 %v427_v47, %v420_v46 }
  0x9b   :  { %v433_v48 = vld [vmem:[#allocation11 + $0x78] sm:$0xff]  ;;  %v442_v52 = vld [vmem:[#allocation11 + $0xc0] sm:$0xff]  ;;  %v1705_v55 = vpack.c.bf16 %v425_v45, %v418_v44  ;;  %v432_v57 = vld [vmem:[#allocation11 + $0x70] sm:$0xff] }
  0x9c   :  { %1670 = vmatpush1.bf16.msra.mxu1 %v1669_v62  ;;  %v439_v58 = vld [vmem:[#allocation11 + $0xa8] sm:$0xff]  ;;  %v1707_v60 = vpack.c.bf16 %v440_v50, %v433_v48  ;;  %v1803_v61 = vpack.c.bf16 %v442_v52, %v435_v51  ;;  %v434_v62 = vld [vmem:[#allocation11 + $0x80] sm:$0xff]  ;;  %v449_v4 = vld [vmem:[#allocation11 + $0xf8] sm:$0xff] }
  0x9d   :  { %1643 = vmatpush3.bf16.msra.mxu0 %v1642_v54  ;;  %1672 = vmatprep.subr.bf16.mxu1 %v1671_v2  ;;  %v447_v2 = vld [vmem:[#allocation11 + $0xe8] sm:$0xff]  ;;  %v454_v3 = vld [vmem:[#allocation11 + $0x120] sm:$0xff]  ;;  %v456_v5 = vld [vmem:[#allocation11 + $0x130] sm:$0xff]  ;;  %v1709_v6 = vpack.c.bf16 %v439_v58, %v432_v57 }
  0x9e   :  { %1644 = vmatprep.subr.bf16.mxu0 %v2303_v0  ;;  %v1711_v10 = vpack.c.bf16 %v454_v3, %v447_v2  ;;  %v1807_v11 = vpack.c.bf16 %v456_v5, %v449_v4  ;;  %v455_v13 = vld [vmem:[#allocation11 + $0x128] sm:$0xff]  ;;  %v461_v14 = vld [vmem:[#allocation11 + $0x158] sm:$0xff]  ;;  %v470_v17 = vld [vmem:[#allocation11 + $0x1a0] sm:$0xff] }
  0x9f   :  { %v463_v16 = vld [vmem:[#allocation11 + $0x168] sm:$0xff]  ;;  %v460_v20 = vld [vmem:[#allocation11 + $0x150] sm:$0xff]  ;;  %v469_v25 = vld [vmem:[#allocation11 + $0x198] sm:$0xff] }
  0xa0   :  { %1674 = vmatpush1.bf16.msra.mxu1 %v1673_v7  ;;  %v1811_v23 = vpack.c.bf16 %v470_v17, %v463_v16  ;;  %v475_v26 = vld [vmem:[#allocation11 + $0x1c8] sm:$0xff]  ;;  %v477_v28 = vld [vmem:[#allocation11 + $0x1d8] sm:$0xff]  ;;  %v484_v29 = vld [vmem:[#allocation11 + $0x210] sm:$0xff] }
  0xa1   :  { %1646 = vmatpush3.bf16.msra.mxu0 %v1645_v63  ;;  %1676 = vmatprep.subr.bf16.mxu1 %v1675_v30  ;;  %v441_v63 = vld [vmem:[#allocation11 + $0xb8] sm:$0xff]  ;;  %v474_v32 = vld [vmem:[#allocation11 + $0x1c0] sm:$0xff]  ;;  %v1815_v35 = vpack.c.bf16 %v484_v29, %v477_v28  ;;  %v483_v37 = vld [vmem:[#allocation11 + $0x208] sm:$0xff] }
  0xa2   :  { %1679 = vmatprep.subr.bf16.mxu0 %v2303_v0  ;;  %v1805_v7 = vpack.c.bf16 %v441_v63, %v434_v62  ;;  %v481_v33 = vld [vmem:[#allocation11 + $0x1f8] sm:$0xff]  ;;  %v496_v39 = vld [vmem:[#allocation11 + $0x270] sm:$0xff]  ;;  %v498_v41 = vld [vmem:[#allocation11 + $0x280] sm:$0xff] }
  0xa3   :  { %v489_v38 = vld [vmem:[#allocation11 + $0x238] sm:$0xff]  ;;  %v488_v44 = vld [vmem:[#allocation11 + $0x230] sm:$0xff]  ;;  %v495_v45 = vld [vmem:[#allocation11 + $0x268] sm:$0xff] }
  0xa4   :  { %1551 = vmatmul.mubr.f32.vlgmr.msra.gmra.mrb[0].mxu0 %v114_v8  ;;  %1678 = vmatpush1.bf16.msra.mxu1 %v1677_v34  ;;  %v446_v8 = vld [vmem:[#allocation11 + $0xe0] sm:$0xff]  ;;  %v1723_v46 = vpack.c.bf16 %v496_v39, %v489_v38  ;;  %v503_v50 = vld [vmem:[#allocation11 + $0x2a8] sm:$0xff]  ;;  %v505_v52 = vld [vmem:[#allocation11 + $0x2b8] sm:$0xff] }
  0xa5   :  { %1681 = vmatpush3.bf16.msra.mxu0 %v1680_v9  ;;  %1585 = vmatprep.mubr.msk.f32.mxu0 %vm2304_vm0, %v2305_v1  ;;  %v453_v9 = vld [vmem:[#allocation11 + $0x118] sm:$0xff]  ;;  %v490_v48 = vld [vmem:[#allocation11 + $0x240] sm:$0xff]  ;;  %v524_v63 = vld [vmem:[#allocation11 + $0x350] sm:$0xff] }
  0xa6   :  { %1682 = vmatprep.subr.bf16.mxu0 %v2303_v0  ;;  %1704 = vmatprep.subr.bf16.mxu1 %v1703_v40  ;;  %v491_v40 = vld [vmem:[#allocation11 + $0x248] sm:$0xff]  ;;  %v510_v51 = vld [vmem:[#allocation11 + $0x2e0] sm:$0xff]  ;;  %v509_v57 = vld [vmem:[#allocation11 + $0x2d8] sm:$0xff] }
  0xa7   :  { %v1819_v47 = vpack.c.bf16 %v498_v41, %v491_v40  ;;  %v1727_v58 = vpack.c.bf16 %v510_v51, %v503_v50  ;;  %v517_v62 = vld [vmem:[#allocation11 + $0x318] sm:$0xff]  ;;  %v519_v2 = vld [vmem:[#allocation11 + $0x328] sm:$0xff]  ;;  %v526_v3 = vld [vmem:[#allocation11 + $0x360] sm:$0xff] }
  0xa8   :  { %v561_v38 = vld [vmem:[#allocation11 + $0x478] sm:$0xff]  ;;  %v568_v39 = vld [vmem:[#allocation11 + $0x4b0] sm:$0xff]  ;;  %v575_v50 = vld [vmem:[#allocation11 + $0x4e8] sm:$0xff] }
  0xa9   :  { %1684 = vmatpush3.bf16.msra.mxu0 %v1683_v12  ;;  %v448_v12 = vld [vmem:[#allocation11 + $0xf0] sm:$0xff]  ;;  %v582_v51 = vld [vmem:[#allocation11 + $0x520] sm:$0xff] }
  0xaa   :  { %1685 = vmatprep.subr.bf16.mxu0 %v2303_v0  ;;  %v1809_v19 = vpack.c.bf16 %v455_v13, %v448_v12  ;;  %v531_v12 = vld [vmem:[#allocation11 + $0x388] sm:$0xff]  ;;  %v538_v13 = vld [vmem:[#allocation11 + $0x3c0] sm:$0xff] }
  0xad   :  { %1687 = vmatpush3.bf16.msra.mxu0 %v1686_v15  ;;  %v468_v15 = vld [vmem:[#allocation11 + $0x190] sm:$0xff] }
  0xae   :  { %1688 = vmatprep.subr.bf16.mxu0 %v2303_v0  ;;  %v1715_v22 = vpack.c.bf16 %v468_v15, %v461_v14  ;;  %v533_v14 = vld [vmem:[#allocation11 + $0x398] sm:$0xff]  ;;  %v540_v15 = vld [vmem:[#allocation11 + $0x3d0] sm:$0xff] }
  0xb1   :  { %1690 = vmatpush3.bf16.msra.mxu0 %v1689_v18  ;;  %v1713_v18 = vpack.c.bf16 %v453_v9, %v446_v8  ;;  %v1731_v8 = vpack.c.bf16 %v524_v63, %v517_v62  ;;  %v1827_v9 = vpack.c.bf16 %v526_v3, %v519_v2  ;;  %v589_v62 = vld [vmem:[#allocation11 + $0x558] sm:$0xff]  ;;  %v596_v63 = vld [vmem:[#allocation11 + $0x590] sm:$0xff] }
  0xb2   :  { %1691 = vmatprep.subr.bf16.mxu0 %v2303_v0 }
  0xb5   :  { %1693 = vmatpush3.bf16.msra.mxu0 %v1692_v21  ;;  %v467_v21 = vld [vmem:[#allocation11 + $0x188] sm:$0xff] }
  0xb6   :  { %1694 = vmatprep.subr.bf16.mxu0 %v2303_v0  ;;  %v1717_v30 = vpack.c.bf16 %v467_v21, %v460_v20  ;;  %v1735_v20 = vpack.c.bf16 %v538_v13, %v531_v12  ;;  %v1831_v21 = vpack.c.bf16 %v540_v15, %v533_v14  ;;  %v603_v12 = vld [vmem:[#allocation11 + $0x5c8] sm:$0xff]  ;;  %v610_v13 = vld [vmem:[#allocation11 + $0x600] sm:$0xff] }
  0xb9   :  { %1696 = vmatpush3.bf16.msra.mxu0 %v1695_v24  ;;  %v462_v24 = vld [vmem:[#allocation11 + $0x160] sm:$0xff] }
  0xba   :  { %1697 = vmatprep.subr.bf16.mxu0 %v2303_v0  ;;  %v1813_v31 = vpack.c.bf16 %v469_v25, %v462_v24  ;;  %v545_v24 = vld [vmem:[#allocation11 + $0x3f8] sm:$0xff]  ;;  %v552_v25 = vld [vmem:[#allocation11 + $0x430] sm:$0xff] }
  0xbd   :  { %1699 = vmatpush3.bf16.msra.mxu0 %v1698_v27  ;;  %v482_v27 = vld [vmem:[#allocation11 + $0x200] sm:$0xff] }
  0xbe   :  { %1700 = vmatprep.subr.bf16.mxu0 %v2303_v0  ;;  %v1719_v34 = vpack.c.bf16 %v482_v27, %v475_v26  ;;  %v547_v26 = vld [vmem:[#allocation11 + $0x408] sm:$0xff]  ;;  %v554_v27 = vld [vmem:[#allocation11 + $0x440] sm:$0xff] }
  0xc1   :  { %1702 = vmatpush3.bf16.msra.mxu0 %v1701_v36  ;;  %v476_v36 = vld [vmem:[#allocation11 + $0x1d0] sm:$0xff] }
  0xc2   :  { %1800 = vmatprep.subr.bf16.mxu0 %v1799_v42  ;;  %v1721_v42 = vpack.c.bf16 %v481_v33, %v474_v32  ;;  %v1739_v32 = vpack.c.bf16 %v552_v25, %v545_v24  ;;  %v1835_v33 = vpack.c.bf16 %v554_v27, %v547_v26  ;;  %v617_v24 = vld [vmem:[#allocation11 + $0x638] sm:$0xff]  ;;  %v624_v25 = vld [vmem:[#allocation11 + $0x670] sm:$0xff] }
 0x177   :  { %v204_v49 = vpop.f32.mrb[0].mxu0 }
 0x178   :  { %v205_v53 = vadd.f32 %v1424_v43, %v204_v49  ;;  %v1552_v54 = vpop.f32.mrb[1].mxu0  ;;  %v1817_v43 = vpack.c.bf16 %v483_v37, %v476_v36  ;;  %v497_v49 = vld [vmem:[#allocation11 + $0x278] sm:$0xff]  ;;  %v559_v36 = vld [vmem:[#allocation11 + $0x468] sm:$0xff]  ;;  %v566_v37 = vld [vmem:[#allocation11 + $0x4a0] sm:$0xff] }
 0x179   :  { %v1725_v54 = vpack.c.bf16 %v495_v45, %v488_v44  ;;  %v1743_v44 = vpack.c.bf16 %v566_v37, %v559_v36  ;;  %v1839_v45 = vpack.c.bf16 %v568_v39, %v561_v38  ;;  %v629_v36 = vld [vmem:[#allocation11 + $0x698] sm:$0xff]  ;;  %v636_v37 = vld [vmem:[#allocation11 + $0x6d0] sm:$0xff]  ;;  %v631_v38 = vld [vmem:[#allocation11 + $0x6a8] sm:$0xff] }
 0x17a   :  { %v208_v59 = vmax.f32 %v205_v53, 0.0  ;;  %v512_v53 = vld [vmem:[#allocation11 + $0x2f0] sm:$0xff]  ;;  %v1763_v39 = vpack.c.bf16 %v636_v37, %v629_v36  ;;  %v687_v37 = vld [vmem:[#allocation11 + $0x868] sm:$0xff] }
 0x17b   :  { %v692_v36 = vld [vmem:[#allocation11 + $0x890] sm:$0xff] }
 0x17c   :  { %339 = vmatmul.mubr.f32.vlgmr.msra.gmra.mrb[0].mxu1 %v208_v59  ;;  %1586 = vmatmul.mubr.f32.vlgmr.msra.gmra.mrb[2].mxu0 %v208_v59  ;;  %v1823_v59 = vpack.c.bf16 %v512_v53, %v505_v52 }
 0x17d   :  { %1706 = vmatpush1.bf16.msra.mxu1 %v1705_v55  ;;  %1802 = vmatpush1.bf16.msra.mxu0 %v1801_v56  ;;  %v1821_v55 = vpack.c.bf16 %v497_v49, %v490_v48  ;;  %v502_v56 = vld [vmem:[#allocation11 + $0x2a0] sm:$0xff]  ;;  %v573_v48 = vld [vmem:[#allocation11 + $0x4d8] sm:$0xff]  ;;  %v580_v49 = vld [vmem:[#allocation11 + $0x510] sm:$0xff] }
 0x17e   :  { %1708 = vmatprep.subr.bf16.mxu1 %v1707_v60  ;;  %1804 = vmatprep.subr.bf16.mxu0 %v1803_v61  ;;  %v504_v60 = vld [vmem:[#allocation11 + $0x2b0] sm:$0xff]  ;;  %v511_v61 = vld [vmem:[#allocation11 + $0x2e8] sm:$0xff]  ;;  %v1729_v4 = vpack.c.bf16 %v509_v57, %v502_v56  ;;  %v1747_v56 = vpack.c.bf16 %v580_v49, %v573_v48  ;;  %v1843_v57 = vpack.c.bf16 %v582_v51, %v575_v50  ;;  %v650_v49 = vld [vmem:[#allocation11 + $0x740] sm:$0xff] }
 0x17f   :  { %v1825_v5 = vpack.c.bf16 %v511_v61, %v504_v60  ;;  %v587_v60 = vld [vmem:[#allocation11 + $0x548] sm:$0xff]  ;;  %v594_v61 = vld [vmem:[#allocation11 + $0x580] sm:$0xff]  ;;  %v645_v50 = vld [vmem:[#allocation11 + $0x718] sm:$0xff] }
 0x180   :  { %v643_v48 = vld [vmem:[#allocation11 + $0x708] sm:$0xff] }
 0x181   :  { %1710 = vmatpush1.bf16.msra.mxu1 %v1709_v6  ;;  %1806 = vmatpush1.bf16.msra.mxu0 %v1805_v7  ;;  %v516_v6 = vld [vmem:[#allocation11 + $0x310] sm:$0xff]  ;;  %v523_v7 = vld [vmem:[#allocation11 + $0x348] sm:$0xff]  ;;  %v1767_v51 = vpack.c.bf16 %v650_v49, %v643_v48  ;;  %v706_v48 = vld [vmem:[#allocation11 + $0x900] sm:$0xff] }
 0x182   :  { %1712 = vmatprep.subr.bf16.mxu1 %v1711_v10  ;;  %1808 = vmatprep.subr.bf16.mxu0 %v1807_v11  ;;  %v518_v10 = vld [vmem:[#allocation11 + $0x320] sm:$0xff]  ;;  %v525_v11 = vld [vmem:[#allocation11 + $0x358] sm:$0xff]  ;;  %v1733_v16 = vpack.c.bf16 %v523_v7, %v516_v6  ;;  %v1751_v6 = vpack.c.bf16 %v594_v61, %v587_v60  ;;  %v1847_v7 = vpack.c.bf16 %v596_v63, %v589_v62 }
 0x183   :  { %v1829_v17 = vpack.c.bf16 %v525_v11, %v518_v10  ;;  %v601_v10 = vld [vmem:[#allocation11 + $0x5b8] sm:$0xff]  ;;  %v608_v11 = vld [vmem:[#allocation11 + $0x5f0] sm:$0xff]  ;;  %v642_v63 = vld [vmem:[#allocation11 + $0x700] sm:$0xff] }
 0x184   :  { %v701_v49 = vld [vmem:[#allocation11 + $0x8d8] sm:$0xff] }
 0x185   :  { %1714 = vmatpush1.bf16.msra.mxu1 %v1713_v18  ;;  %1810 = vmatpush1.bf16.msra.mxu0 %v1809_v19  ;;  %v530_v18 = vld [vmem:[#allocation11 + $0x380] sm:$0xff]  ;;  %v537_v19 = vld [vmem:[#allocation11 + $0x3b8] sm:$0xff] }
 0x186   :  { %1716 = vmatprep.subr.bf16.mxu1 %v1715_v22  ;;  %1812 = vmatprep.subr.bf16.mxu0 %v1811_v23  ;;  %v532_v22 = vld [vmem:[#allocation11 + $0x390] sm:$0xff]  ;;  %v539_v23 = vld [vmem:[#allocation11 + $0x3c8] sm:$0xff]  ;;  %v1737_v28 = vpack.c.bf16 %v537_v19, %v530_v18  ;;  %v1755_v18 = vpack.c.bf16 %v608_v11, %v601_v10  ;;  %v1851_v19 = vpack.c.bf16 %v610_v13, %v603_v12  ;;  %v666_v12 = vld [vmem:[#allocation11 + $0x7c0] sm:$0xff] }
 0x187   :  { %v1833_v29 = vpack.c.bf16 %v539_v23, %v532_v22  ;;  %v615_v22 = vld [vmem:[#allocation11 + $0x628] sm:$0xff]  ;;  %v622_v23 = vld [vmem:[#allocation11 + $0x660] sm:$0xff]  ;;  %v664_v10 = vld [vmem:[#allocation11 + $0x7b0] sm:$0xff] }
 0x188   :  { %v659_v11 = vld [vmem:[#allocation11 + $0x788] sm:$0xff] }
 0x189   :  { %1718 = vmatpush1.bf16.msra.mxu1 %v1717_v30  ;;  %1814 = vmatpush1.bf16.msra.mxu0 %v1813_v31  ;;  %v544_v30 = vld [vmem:[#allocation11 + $0x3f0] sm:$0xff]  ;;  %v551_v31 = vld [vmem:[#allocation11 + $0x428] sm:$0xff] }
 0x18a   :  { %1720 = vmatprep.subr.bf16.mxu1 %v1719_v34  ;;  %1816 = vmatprep.subr.bf16.mxu0 %v1815_v35  ;;  %v546_v34 = vld [vmem:[#allocation11 + $0x400] sm:$0xff]  ;;  %v553_v35 = vld [vmem:[#allocation11 + $0x438] sm:$0xff]  ;;  %v1741_v40 = vpack.c.bf16 %v551_v31, %v544_v30  ;;  %v1855_v30 = vpack.c.bf16 %v624_v25, %v617_v24 }
 0x18b   :  { %v1837_v41 = vpack.c.bf16 %v553_v35, %v546_v34  ;;  %v621_v31 = vld [vmem:[#allocation11 + $0x658] sm:$0xff]  ;;  %v678_v24 = vld [vmem:[#allocation11 + $0x820] sm:$0xff] }
 0x18c   :  { %v673_v25 = vld [vmem:[#allocation11 + $0x7f8] sm:$0xff] }
 0x18d   :  { %1722 = vmatpush1.bf16.msra.mxu1 %v1721_v42  ;;  %1818 = vmatpush1.bf16.msra.mxu0 %v1817_v43  ;;  %v558_v42 = vld [vmem:[#allocation11 + $0x460] sm:$0xff]  ;;  %v565_v43 = vld [vmem:[#allocation11 + $0x498] sm:$0xff] }
 0x18e   :  { %1724 = vmatprep.subr.bf16.mxu1 %v1723_v46  ;;  %1820 = vmatprep.subr.bf16.mxu0 %v1819_v47  ;;  %v560_v46 = vld [vmem:[#allocation11 + $0x470] sm:$0xff]  ;;  %v567_v47 = vld [vmem:[#allocation11 + $0x4a8] sm:$0xff]  ;;  %v1745_v52 = vpack.c.bf16 %v565_v43, %v558_v42 }
 0x18f   :  { %v1841_v53 = vpack.c.bf16 %v567_v47, %v560_v46  ;;  %v635_v42 = vld [vmem:[#allocation11 + $0x6c8] sm:$0xff]  ;;  %v637_v46 = vld [vmem:[#allocation11 + $0x6d8] sm:$0xff] }
 0x191   :  { %1726 = vmatpush1.bf16.msra.mxu1 %v1725_v54  ;;  %1822 = vmatpush1.bf16.msra.mxu0 %v1821_v55  ;;  %v572_v54 = vld [vmem:[#allocation11 + $0x4d0] sm:$0xff]  ;;  %v579_v55 = vld [vmem:[#allocation11 + $0x508] sm:$0xff] }
 0x192   :  { %1728 = vmatprep.subr.bf16.mxu1 %v1727_v58  ;;  %1824 = vmatprep.subr.bf16.mxu0 %v1823_v59  ;;  %v574_v58 = vld [vmem:[#allocation11 + $0x4e0] sm:$0xff]  ;;  %v581_v59 = vld [vmem:[#allocation11 + $0x518] sm:$0xff]  ;;  %v1749_v2 = vpack.c.bf16 %v579_v55, %v572_v54  ;;  %v259_v54 = vlaneseq }
 0x193   :  { %v1845_v3 = vpack.c.bf16 %v581_v59, %v574_v58 }
 0x194   :  { %v2452_v55 = vshrl.u32 %v259_v54, 7  ;;  %v705_v54 = vld [vmem:[#allocation11 + $0x8f8] sm:$0xff] }
 0x195   :  { %1730 = vmatpush1.bf16.msra.mxu1 %v1729_v4  ;;  %1826 = vmatpush1.bf16.msra.mxu0 %v1825_v5  ;;  %v586_v4 = vld [vmem:[#allocation11 + $0x540] sm:$0xff]  ;;  %v593_v5 = vld [vmem:[#allocation11 + $0x578] sm:$0xff] }
 0x196   :  { %1732 = vmatprep.subr.bf16.mxu1 %v1731_v8  ;;  %1828 = vmatprep.subr.bf16.mxu0 %v1827_v9  ;;  %v588_v8 = vld [vmem:[#allocation11 + $0x550] sm:$0xff]  ;;  %v595_v9 = vld [vmem:[#allocation11 + $0x588] sm:$0xff]  ;;  %v1753_v14 = vpack.c.bf16 %v593_v5, %v586_v4  ;;  %v265_v58 = vsub.s32 1, %v2452_v55 }
 0x197   :  { %v1849_v15 = vpack.c.bf16 %v595_v9, %v588_v8  ;;  %v657_v8 = vld [vmem:[#allocation11 + $0x778] sm:$0xff] }
 0x199   :  { %1734 = vmatpush1.bf16.msra.mxu1 %v1733_v16  ;;  %1830 = vmatpush1.bf16.msra.mxu0 %v1829_v17  ;;  %v600_v16 = vld [vmem:[#allocation11 + $0x5b0] sm:$0xff]  ;;  %v607_v17 = vld [vmem:[#allocation11 + $0x5e8] sm:$0xff] }
 0x19a   :  { %1736 = vmatprep.subr.bf16.mxu1 %v1735_v20  ;;  %1832 = vmatprep.subr.bf16.mxu0 %v1831_v21  ;;  %v602_v20 = vld [vmem:[#allocation11 + $0x5c0] sm:$0xff]  ;;  %v609_v21 = vld [vmem:[#allocation11 + $0x5f8] sm:$0xff]  ;;  %v1757_v26 = vpack.c.bf16 %v607_v17, %v600_v16  ;;  %v656_v16 = vld [vmem:[#allocation11 + $0x770] sm:$0xff] }
 0x19b   :  { %v1853_v27 = vpack.c.bf16 %v609_v21, %v602_v20  ;;  %v663_v17 = vld [vmem:[#allocation11 + $0x7a8] sm:$0xff]  ;;  %v1867_v20 = vpack.c.bf16 %v666_v12, %v659_v11  ;;  %v658_v21 = vld [vmem:[#allocation11 + $0x780] sm:$0xff] }
 0x19c   :  { %v714_v12 = vld [vmem:[#allocation11 + $0x940] sm:$0xff] }
 0x19d   :  { %1738 = vmatpush1.bf16.msra.mxu1 %v1737_v28  ;;  %1834 = vmatpush1.bf16.msra.mxu0 %v1833_v29  ;;  %v614_v28 = vld [vmem:[#allocation11 + $0x620] sm:$0xff]  ;;  %v1759_v29 = vpack.c.bf16 %v622_v23, %v615_v22  ;;  %v665_v22 = vld [vmem:[#allocation11 + $0x7b8] sm:$0xff]  ;;  %v671_v23 = vld [vmem:[#allocation11 + $0x7e8] sm:$0xff] }
 0x19e   :  { %1740 = vmatprep.subr.bf16.mxu1 %v1739_v32  ;;  %1836 = vmatprep.subr.bf16.mxu0 %v1835_v33  ;;  %v616_v32 = vld [vmem:[#allocation11 + $0x630] sm:$0xff]  ;;  %v623_v33 = vld [vmem:[#allocation11 + $0x668] sm:$0xff]  ;;  %v1761_v34 = vpack.c.bf16 %v621_v31, %v614_v28  ;;  %v1869_v28 = vpack.c.bf16 %v665_v22, %v658_v21  ;;  %v1775_v31 = vpack.c.bf16 %v678_v24, %v671_v23  ;;  %v726_v22 = vld [vmem:[#allocation11 + $0x9a0] sm:$0xff]  ;;  %v269_v24 = vsub.s32 2, %v2452_v55 }
 0x19f   :  { %v1857_v35 = vpack.c.bf16 %v623_v33, %v616_v32  ;;  %v672_v33 = vld [vmem:[#allocation11 + $0x7f0] sm:$0xff]  ;;  %v733_v23 = vld [vmem:[#allocation11 + $0x9d8] sm:$0xff] }
 0x1a1   :  { %1742 = vmatpush1.bf16.msra.mxu1 %v1741_v40  ;;  %1838 = vmatpush1.bf16.msra.mxu0 %v1837_v41  ;;  %v638_v40 = vld [vmem:[#allocation11 + $0x6e0] sm:$0xff]  ;;  %v628_v41 = vld [vmem:[#allocation11 + $0x690] sm:$0xff] }
 0x1a2   :  { %1744 = vmatprep.subr.bf16.mxu1 %v1743_v44  ;;  %1840 = vmatprep.subr.bf16.mxu0 %v1839_v45  ;;  %v1859_v43 = vpack.c.bf16 %v638_v40, %v631_v38  ;;  %v1765_v44 = vpack.c.bf16 %v635_v42, %v628_v41  ;;  %v630_v45 = vld [vmem:[#allocation11 + $0x6a0] sm:$0xff]  ;;  %v684_v41 = vld [vmem:[#allocation11 + $0x850] sm:$0xff]  ;;  %v691_v42 = vld [vmem:[#allocation11 + $0x888] sm:$0xff] }
 0x1a3   :  { %v1861_v47 = vpack.c.bf16 %v637_v46, %v630_v45  ;;  %v694_v38 = vld [vmem:[#allocation11 + $0x8a0] sm:$0xff]  ;;  %v693_v46 = vld [vmem:[#allocation11 + $0x898] sm:$0xff] }
 0x1a4   :  { %v686_v45 = vld [vmem:[#allocation11 + $0x860] sm:$0xff] }
 0x1a5   :  { %1746 = vmatpush1.bf16.msra.mxu1 %v1745_v52  ;;  %1842 = vmatpush1.bf16.msra.mxu0 %v1841_v53  ;;  %v652_v52 = vld [vmem:[#allocation11 + $0x750] sm:$0xff] }
 0x1a6   :  { %1748 = vmatprep.subr.bf16.mxu1 %v1747_v56  ;;  %1844 = vmatprep.subr.bf16.mxu0 %v1843_v57  ;;  %v1863_v53 = vpack.c.bf16 %v652_v52, %v645_v50  ;;  %v261_v56 = vsub.s32 0, %v2452_v55  ;;  %v2455_v57 = vld [vmem:[#allocation10] sm:$0x7]  ;;  %v708_v50 = vld [vmem:[#allocation11 + $0x910] sm:$0xff]  ;;  %v1877_v52 = vpack.c.bf16 %v693_v46, %v686_v45  ;;  %v543_v45 = vld [vmem:[#allocation11 + $0x3e8] sm:$0xff] }
 0x1a7   :  { %v266_v60 = vrot.slane %v2455_v57, %v265_v58 }
 0x1a8   :  { %v262_v59 = vrot.slane %v2455_v57, %v261_v56 }
 0x1a9   :  { %1750 = vmatpush1.bf16.msra.mxu1 %v1749_v2  ;;  %1846 = vmatpush1.bf16.msra.mxu0 %v1845_v3  ;;  %v649_v2 = vld [vmem:[#allocation11 + $0x738] sm:$0xff] }
 0x1aa   :  { %1752 = vmatprep.subr.bf16.mxu1 %v1751_v6  ;;  %1848 = vmatprep.subr.bf16.mxu0 %v1847_v7  ;;  %v644_v6 = vld [vmem:[#allocation11 + $0x710] sm:$0xff]  ;;  %v651_v7 = vld [vmem:[#allocation11 + $0x748] sm:$0xff] }
 0x1ad   :  { %1754 = vmatpush1.bf16.msra.mxu1 %v1753_v14  ;;  %1850 = vmatpush1.bf16.msra.mxu0 %v1849_v15  ;;  %v1769_v14 = vpack.c.bf16 %v649_v2, %v642_v63  ;;  %v1865_v15 = vpack.c.bf16 %v651_v7, %v644_v6  ;;  %v707_v63 = vld [vmem:[#allocation11 + $0x908] sm:$0xff]  ;;  %v713_v2 = vld [vmem:[#allocation11 + $0x938] sm:$0xff] }
 0x1ae   :  { %1756 = vmatprep.subr.bf16.mxu1 %v1755_v18  ;;  %1852 = vmatprep.subr.bf16.mxu0 %v1851_v19  ;;  %v1771_v19 = vpack.c.bf16 %v664_v10, %v657_v8  ;;  %v712_v8 = vld [vmem:[#allocation11 + $0x930] sm:$0xff] }
 0x1b1   :  { %1758 = vmatpush1.bf16.msra.mxu1 %v1757_v26  ;;  %1854 = vmatpush1.bf16.msra.mxu0 %v1853_v27  ;;  %v680_v26 = vld [vmem:[#allocation11 + $0x830] sm:$0xff]  ;;  %v1773_v27 = vpack.c.bf16 %v663_v17, %v656_v16  ;;  %v734_v16 = vld [vmem:[#allocation11 + $0x9e0] sm:$0xff]  ;;  %v729_v17 = vld [vmem:[#allocation11 + $0x9b8] sm:$0xff] }
 0x1b2   :  { %1760 = vmatprep.subr.bf16.mxu1 %v1759_v29  ;;  %1856 = vmatprep.subr.bf16.mxu0 %v1855_v30  ;;  %v670_v29 = vld [vmem:[#allocation11 + $0x7e0] sm:$0xff]  ;;  %v677_v30 = vld [vmem:[#allocation11 + $0x818] sm:$0xff]  ;;  %v1871_v32 = vpack.c.bf16 %v680_v26, %v673_v25 }
 0x1b5   :  { %1762 = vmatpush1.bf16.msra.mxu1 %v1761_v34  ;;  %1858 = vmatpush1.bf16.msra.mxu0 %v1857_v35  ;;  %v679_v34 = vld [vmem:[#allocation11 + $0x828] sm:$0xff]  ;;  %v685_v35 = vld [vmem:[#allocation11 + $0x858] sm:$0xff] }
 0x1b6   :  { %1764 = vmatprep.subr.bf16.mxu1 %v1763_v39  ;;  %1860 = vmatprep.subr.bf16.mxu0 %v1859_v43  ;;  %v1777_v39 = vpack.c.bf16 %v677_v30, %v670_v29  ;;  %v1873_v40 = vpack.c.bf16 %v679_v34, %v672_v33  ;;  %v1779_v43 = vpack.c.bf16 %v692_v36, %v685_v35  ;;  %v741_v29 = vld [vmem:[#allocation11 + $0xa18] sm:$0xff]  ;;  %v748_v30 = vld [vmem:[#allocation11 + $0xa50] sm:$0xff]  ;;  %v747_v36 = vld [vmem:[#allocation11 + $0xa48] sm:$0xff] }
 0x1b7   :  { %v1793_v33 = vpack.c.bf16 %v733_v23, %v726_v22  ;;  %v740_v35 = vld [vmem:[#allocation11 + $0xa10] sm:$0xff]  ;;  %v459_v22 = vld [vmem:[#allocation11 + $0x148] sm:$0xff]  ;;  %v465_v23 = vld [vmem:[#allocation11 + $0x178] sm:$0xff] }
 0x1b8   :  { %v1797_v46 = vpack.c.bf16 %v747_v36, %v740_v35  ;;  %v479_v35 = vld [vmem:[#allocation11 + $0x1e8] sm:$0xff]  ;;  %v486_v36 = vld [vmem:[#allocation11 + $0x220] sm:$0xff] }
 0x1b9   :  { %1766 = vmatpush1.bf16.msra.mxu1 %v1765_v44  ;;  %1862 = vmatpush1.bf16.msra.mxu0 %v1861_v47  ;;  %v1875_v44 = vpack.c.bf16 %v694_v38, %v687_v37  ;;  %v699_v47 = vld [vmem:[#allocation11 + $0x8c8] sm:$0xff]  ;;  %v270_v37 = vrot.slane %v2455_v57, %v269_v24  ;;  %v1795_v38 = vpack.c.bf16 %v748_v30, %v741_v29 }
 0x1ba   :  { %1768 = vmatprep.subr.bf16.mxu1 %v1767_v51  ;;  %1864 = vmatprep.subr.bf16.mxu0 %v1863_v53  ;;  %v1781_v51 = vpack.c.bf16 %v691_v42, %v684_v41  ;;  %v698_v53 = vld [vmem:[#allocation11 + $0x8c0] sm:$0xff]  ;;  %v749_v41 = vld [vmem:[#allocation11 + $0xa58] sm:$0xff]  ;;  %v423_v42 = vld [vmem:[#allocation11 + $0x28] sm:$0xff] }
 0x1bb   :  { %v1785_v6 = vpack.c.bf16 %v705_v54, %v698_v53  ;;  %v431_v53 = vld [vmem:[#allocation11 + $0x68] sm:$0xff]  ;;  %v437_v54 = vld [vmem:[#allocation11 + $0x98] sm:$0xff] }
 0x24f   :  { %v340_v61 = vpop.f32.mrb[0].mxu1  ;;  %v2464_v62 = vpop.f32.mrb[2].mxu0 }
 0x250   :  { %v341_v3 = vadd.f32 %v340_v61, %v262_v59  ;;  %v342_v4 = vpop.f32.mrb[1].mxu1  ;;  %v1587_v5 = vpop.f32.mrb[3].mxu0  ;;  %v1783_v59 = vpack.c.bf16 %v706_v48, %v699_v47  ;;  %v700_v61 = vld [vmem:[#allocation11 + $0x8d0] sm:$0xff]  ;;  %v412_v48 = vadd.f32 %v2464_v62, %v270_v37 }
 0x251   :  { %v343_v9 = vadd.f32 %v342_v4, %v266_v60  ;;  %v1879_v60 = vpack.c.bf16 %v708_v50, %v701_v49  ;;  %v715_v4 = vld [vmem:[#allocation11 + $0x948] sm:$0xff]  ;;  %v722_v5 = vld [vmem:[#allocation11 + $0x980] sm:$0xff]  ;;  %v1881_v7 = vpack.c.bf16 %v707_v63, %v700_v61  ;;  %v557_v61 = vld [vmem:[#allocation11 + $0x458] sm:$0xff] }
 0x252   :  { %v2468_v18 = vmax.f32 %v341_v3, 0.0  ;;  %v720_v3 = vld [vmem:[#allocation11 + $0x970] sm:$0xff]  ;;  %v1883_v11 = vpack.c.bf16 %v722_v5, %v715_v4  ;;  %v422_v50 = vld [vmem:[#allocation11 + $0x20] sm:$0xff]  ;;  %v443_v4 = vld [vmem:[#allocation11 + $0xc8] sm:$0xff] }
 0x253   :  { %v2466_v13 = vmax.f32 %v343_v9, 0.0  ;;  %v719_v9 = vld [vmem:[#allocation11 + $0x968] sm:$0xff]  ;;  %v1787_v10 = vpack.c.bf16 %v720_v3, %v713_v2  ;;  %v2481_v2 = vmax.f32 %v412_v48, 0.0  ;;  %v436_v3 = vld [vmem:[#allocation11 + $0x90] sm:$0xff]  ;;  %v438_v5 = vld [vmem:[#allocation11 + $0xa0] sm:$0xff] }
 0x254   :  { %v592_v37 = vld [vmem:[#allocation11 + $0x570] sm:$0xff] }
 0x255   :  { %855 = vmatprep.mubr.f32.mxu1 %v2466_v13  ;;  %997 = vmatprep.mubr.f32.mxu0 %v2466_v13  ;;  %v500_v48 = vld [vmem:[#allocation11 + $0x290] sm:$0xff] }
 0x256   :  { %856 = vmatmul.mubr.f32.vlgmr.msra.gmra.mrb[2].mxu1 %v2468_v18  ;;  %998 = vmatmul.mubr.f32.vlgmr.msra.gmra.mrb[4].mxu0 %v2468_v18 }
 0x257   :  { %1770 = vmatpush1.bf16.msra.mxu1 %v1769_v14  ;;  %1866 = vmatpush1.bf16.msra.mxu0 %v1865_v15  ;;  %v721_v14 = vld [vmem:[#allocation11 + $0x978] sm:$0xff]  ;;  %v727_v15 = vld [vmem:[#allocation11 + $0x9a8] sm:$0xff] }
 0x258   :  { %1772 = vmatprep.subr.bf16.mxu1 %v1771_v19  ;;  %1868 = vmatprep.subr.bf16.mxu0 %v1867_v20  ;;  %v736_v19 = vld [vmem:[#allocation11 + $0x9f0] sm:$0xff]  ;;  %v1789_v20 = vpack.c.bf16 %v719_v9, %v712_v8  ;;  %v1885_v21 = vpack.c.bf16 %v721_v14, %v714_v12  ;;  %v1791_v25 = vpack.c.bf16 %v734_v16, %v727_v15  ;;  %v445_v8 = vld [vmem:[#allocation11 + $0xd8] sm:$0xff]  ;;  %v451_v9 = vld [vmem:[#allocation11 + $0x108] sm:$0xff] }
 0x259   :  { %926 = vmatprep.mubr.f32.mxu1 %v2305_v1  ;;  %1068 = vmatprep.mubr.f32.mxu0 %v2305_v1  ;;  %v1887_v26 = vpack.c.bf16 %v736_v19, %v729_v17  ;;  %v571_v12 = vld [vmem:[#allocation11 + $0x4c8] sm:$0xff]  ;;  %v1901_v14 = vpack.c.bf16 %v443_v4, %v436_v3  ;;  %v1997_v15 = vpack.c.bf16 %v445_v8, %v438_v5  ;;  %v450_v17 = vld [vmem:[#allocation11 + $0x100] sm:$0xff]  ;;  %v457_v19 = vld [vmem:[#allocation11 + $0x138] sm:$0xff] }
 0x25a   :  { %v620_v3 = vld [vmem:[#allocation11 + $0x650] sm:$0xff]  ;;  %v627_v4 = vld [vmem:[#allocation11 + $0x688] sm:$0xff]  ;;  %v506_v8 = vld [vmem:[#allocation11 + $0x2c0] sm:$0xff] }
 0x25b   :  { %1774 = vmatpush1.bf16.msra.mxu1 %v1773_v27  ;;  %1870 = vmatpush1.bf16.msra.mxu0 %v1869_v28  ;;  %v728_v27 = vld [vmem:[#allocation11 + $0x9b0] sm:$0xff]  ;;  %v735_v28 = vld [vmem:[#allocation11 + $0x9e8] sm:$0xff] }
 0x25c   :  { %1776 = vmatprep.subr.bf16.mxu1 %v1775_v31  ;;  %1872 = vmatprep.subr.bf16.mxu0 %v1871_v32  ;;  %v743_v31 = vld [vmem:[#allocation11 + $0xa28] sm:$0xff]  ;;  %v750_v32 = vld [vmem:[#allocation11 + $0xa60] sm:$0xff]  ;;  %v1889_v34 = vpack.c.bf16 %v735_v28, %v728_v27  ;;  %v585_v27 = vld [vmem:[#allocation11 + $0x538] sm:$0xff]  ;;  %v1905_v28 = vpack.c.bf16 %v457_v19, %v450_v17 }
 0x25d   :  { %v641_v17 = vld [vmem:[#allocation11 + $0x6f8] sm:$0xff] }
 0x25f   :  { %1778 = vmatpush1.bf16.msra.mxu1 %v1777_v39  ;;  %1874 = vmatpush1.bf16.msra.mxu0 %v1873_v40  ;;  %v1891_v39 = vpack.c.bf16 %v750_v32, %v743_v31  ;;  %v742_v40 = vld [vmem:[#allocation11 + $0xa20] sm:$0xff]  ;;  %v471_v31 = vld [vmem:[#allocation11 + $0x1a8] sm:$0xff] }
 0x260   :  { %1780 = vmatprep.subr.bf16.mxu1 %v1779_v43  ;;  %1876 = vmatprep.subr.bf16.mxu0 %v1875_v44  ;;  %v430_v43 = vld [vmem:[#allocation11 + $0x60] sm:$0xff]  ;;  %v536_v44 = vld [vmem:[#allocation11 + $0x3b0] sm:$0xff]  ;;  %v1893_v47 = vpack.c.bf16 %v749_v41, %v742_v40  ;;  %v1911_v41 = vpack.c.bf16 %v486_v36, %v479_v35  ;;  %v655_v35 = vld [vmem:[#allocation11 + $0x768] sm:$0xff] }
 0x261   :  { %v1895_v49 = vpack.c.bf16 %v430_v43, %v423_v42  ;;  %v1991_v57 = vpack.c.bf16 %v543_v45, %v536_v44  ;;  %v466_v32 = vld [vmem:[#allocation11 + $0x180] sm:$0xff]  ;;  %v485_v43 = vld [vmem:[#allocation11 + $0x218] sm:$0xff]  ;;  %v480_v44 = vld [vmem:[#allocation11 + $0x1f0] sm:$0xff] }
 0x262   :  { %v478_v42 = vld [vmem:[#allocation11 + $0x1e0] sm:$0xff]  ;;  %v549_v36 = vld [vmem:[#allocation11 + $0x418] sm:$0xff] }
 0x263   :  { %1782 = vmatpush1.bf16.msra.mxu1 %v1781_v51  ;;  %1878 = vmatpush1.bf16.msra.mxu0 %v1877_v52  ;;  %v429_v51 = vld [vmem:[#allocation11 + $0x58] sm:$0xff]  ;;  %v424_v52 = vld [vmem:[#allocation11 + $0x30] sm:$0xff] }
 0x264   :  { %1784 = vmatprep.subr.bf16.mxu1 %v1783_v59  ;;  %1880 = vmatprep.subr.bf16.mxu0 %v1879_v60  ;;  %v444_v59 = vld [vmem:[#allocation11 + $0xd0] sm:$0xff]  ;;  %v550_v60 = vld [vmem:[#allocation11 + $0x420] sm:$0xff]  ;;  %v1897_v63 = vpack.c.bf16 %v429_v51, %v422_v50  ;;  %v1993_v62 = vpack.c.bf16 %v431_v53, %v424_v52  ;;  %v1913_v50 = vpack.c.bf16 %v485_v43, %v478_v42  ;;  %v555_v42 = vld [vmem:[#allocation11 + $0x448] sm:$0xff] }
 0x265   :  { %v492_v53 = vld [vmem:[#allocation11 + $0x250] sm:$0xff]  ;;  %v662_v43 = vld [vmem:[#allocation11 + $0x7a0] sm:$0xff] }
 0x267   :  { %1786 = vmatpush1.bf16.msra.mxu1 %v1785_v6  ;;  %1882 = vmatpush1.bf16.msra.mxu0 %v1881_v7  ;;  %v1899_v6 = vpack.c.bf16 %v444_v59, %v437_v54  ;;  %v1995_v7 = vpack.c.bf16 %v557_v61, %v550_v60  ;;  %v499_v54 = vld [vmem:[#allocation11 + $0x288] sm:$0xff]  ;;  %v494_v59 = vld [vmem:[#allocation11 + $0x260] sm:$0xff]  ;;  %v501_v61 = vld [vmem:[#allocation11 + $0x298] sm:$0xff] }
 0x268   :  { %1788 = vmatprep.subr.bf16.mxu1 %v1787_v10  ;;  %1884 = vmatprep.subr.bf16.mxu0 %v1883_v11  ;;  %v458_v10 = vld [vmem:[#allocation11 + $0x140] sm:$0xff]  ;;  %v564_v11 = vld [vmem:[#allocation11 + $0x490] sm:$0xff]  ;;  %v1917_v5 = vpack.c.bf16 %v499_v54, %v492_v53  ;;  %v577_v53 = vld [vmem:[#allocation11 + $0x4f8] sm:$0xff] }
 0x269   :  { %v1903_v16 = vpack.c.bf16 %v458_v10, %v451_v9  ;;  %v513_v9 = vld [vmem:[#allocation11 + $0x2f8] sm:$0xff]  ;;  %v508_v10 = vld [vmem:[#allocation11 + $0x2d0] sm:$0xff] }
 0x26a   :  { %v1921_v19 = vpack.c.bf16 %v513_v9, %v506_v8  ;;  %v584_v54 = vld [vmem:[#allocation11 + $0x530] sm:$0xff] }
 0x26b   :  { %1790 = vmatpush1.bf16.msra.mxu1 %v1789_v20  ;;  %1886 = vmatpush1.bf16.msra.mxu0 %v1885_v21  ;;  %v452_v20 = vld [vmem:[#allocation11 + $0x110] sm:$0xff]  ;;  %v1999_v21 = vpack.c.bf16 %v571_v12, %v564_v11  ;;  %v2015_v11 = vpack.c.bf16 %v627_v4, %v620_v3  ;;  %v515_v12 = vld [vmem:[#allocation11 + $0x308] sm:$0xff]  ;;  %v690_v3 = vld [vmem:[#allocation11 + $0x880] sm:$0xff] }
 0x26c   :  { %1792 = vmatprep.subr.bf16.mxu1 %v1791_v25  ;;  %1888 = vmatprep.subr.bf16.mxu0 %v1887_v26  ;;  %v472_v25 = vld [vmem:[#allocation11 + $0x1b0] sm:$0xff]  ;;  %v578_v26 = vld [vmem:[#allocation11 + $0x500] sm:$0xff]  ;;  %v2001_v29 = vpack.c.bf16 %v459_v22, %v452_v20  ;;  %v2017_v20 = vpack.c.bf16 %v515_v12, %v508_v10  ;;  %v697_v4 = vld [vmem:[#allocation11 + $0x8b8] sm:$0xff] }
 0x26d   :  { %v1907_v30 = vpack.c.bf16 %v472_v25, %v465_v23  ;;  %v520_v22 = vld [vmem:[#allocation11 + $0x330] sm:$0xff]  ;;  %v527_v23 = vld [vmem:[#allocation11 + $0x368] sm:$0xff]  ;;  %v522_v25 = vld [vmem:[#allocation11 + $0x340] sm:$0xff]  ;;  %v2033_v8 = vpack.c.bf16 %v697_v4, %v690_v3 }
 0x26e   :  { %v590_v10 = vld [vmem:[#allocation11 + $0x560] sm:$0xff]  ;;  %v704_v12 = vld [vmem:[#allocation11 + $0x8f0] sm:$0xff]  ;;  %v689_v3 = vld [vmem:[#allocation11 + $0x878] sm:$0xff] }
 0x26f   :  { %1794 = vmatpush1.bf16.msra.mxu1 %v1793_v33  ;;  %1890 = vmatpush1.bf16.msra.mxu0 %v1889_v34  ;;  %v2003_v33 = vpack.c.bf16 %v585_v27, %v578_v26  ;;  %v473_v34 = vld [vmem:[#allocation11 + $0x1b8] sm:$0xff]  ;;  %v696_v4 = vld [vmem:[#allocation11 + $0x8b0] sm:$0xff] }
 0x270   :  { %1796 = vmatprep.subr.bf16.mxu1 %v1795_v38  ;;  %1892 = vmatprep.subr.bf16.mxu0 %v1891_v39  ;;  %v599_v38 = vld [vmem:[#allocation11 + $0x5a8] sm:$0xff]  ;;  %v2005_v40 = vpack.c.bf16 %v473_v34, %v466_v32  ;;  %v529_v27 = vld [vmem:[#allocation11 + $0x378] sm:$0xff]  ;;  %v534_v32 = vld [vmem:[#allocation11 + $0x3a0] sm:$0xff] }
 0x271   :  { %v2007_v45 = vpack.c.bf16 %v599_v38, %v592_v37  ;;  %v648_v34 = vld [vmem:[#allocation11 + $0x730] sm:$0xff] }
 0x272   :  { %v556_v37 = vld [vmem:[#allocation11 + $0x450] sm:$0xff] }
 0x273   :  { %1798 = vmatpush1.bf16.msra.mxu1 %v1797_v46  ;;  %1894 = vmatpush1.bf16.msra.mxu0 %v1893_v47  ;;  %v487_v46 = vld [vmem:[#allocation11 + $0x228] sm:$0xff]  ;;  %v493_v47 = vld [vmem:[#allocation11 + $0x258] sm:$0xff] }
 0x274   :  { %1896 = vmatprep.subr.bf16.mxu1 %v1895_v49  ;;  %1992 = vmatprep.subr.bf16.mxu0 %v1991_v57  ;;  %v606_v49 = vld [vmem:[#allocation11 + $0x5e0] sm:$0xff]  ;;  %v613_v57 = vld [vmem:[#allocation11 + $0x618] sm:$0xff]  ;;  %v2009_v51 = vpack.c.bf16 %v487_v46, %v480_v44  ;;  %v1915_v52 = vpack.c.bf16 %v500_v48, %v493_v47 }
 0x275   :  { %v2011_v60 = vpack.c.bf16 %v613_v57, %v606_v49  ;;  %v669_v44 = vld [vmem:[#allocation11 + $0x7d8] sm:$0xff]  ;;  %v570_v46 = vld [vmem:[#allocation11 + $0x4c0] sm:$0xff] }
 0x276   :  { %927 = vmatmul.mubr.f32.vlgmr.msra.gmra.mrb[2].mxu1 %v2481_v2  ;;  %1069 = vmatmul.mubr.f32.vlgmr.msra.gmra.mrb[4].mxu0 %v2481_v2  ;;  %v2027_v48 = vpack.c.bf16 %v669_v44, %v662_v43  ;;  %v562_v57 = vld [vmem:[#allocation11 + $0x480] sm:$0xff]  ;;  %v647_v43 = vld [vmem:[#allocation11 + $0x728] sm:$0xff] }
 0x277   :  { %1898 = vmatpush1.bf16.msra.mxu1 %v1897_v63  ;;  %1139 = vmatprep.mubr.f32.mxu1 %v2466_v13  ;;  %v507_v63 = vld [vmem:[#allocation11 + $0x2c8] sm:$0xff]  ;;  %v654_v44 = vld [vmem:[#allocation11 + $0x760] sm:$0xff] }
 0x278   :  { %1994 = vmatpush3.bf16.msra.mxu0 %v1993_v62  ;;  %1281 = vmatprep.mubr.f32.mxu0 %v2466_v13  ;;  %v464_v13 = vld [vmem:[#allocation11 + $0x170] sm:$0xff]  ;;  %v514_v62 = vld [vmem:[#allocation11 + $0x300] sm:$0xff] }
 0x279   :  { %1900 = vmatprep.subr.bf16.mxu1 %v1899_v6  ;;  %1996 = vmatprep.subr.bf16.mxu0 %v1995_v7  ;;  %v1909_v39 = vpack.c.bf16 %v471_v31, %v464_v13  ;;  %v2013_v6 = vpack.c.bf16 %v501_v61, %v494_v59  ;;  %v1919_v7 = vpack.c.bf16 %v514_v62, %v507_v63  ;;  %v576_v63 = vld [vmem:[#allocation11 + $0x4f0] sm:$0xff]  ;;  %v583_v62 = vld [vmem:[#allocation11 + $0x528] sm:$0xff] }
 0x27a   :  { %v2021_v13 = vpack.c.bf16 %v529_v27, %v522_v25  ;;  %v1939_v61 = vpack.c.bf16 %v584_v54, %v577_v53  ;;  %v725_v25 = vld [vmem:[#allocation11 + $0x998] sm:$0xff]  ;;  %v626_v27 = vld [vmem:[#allocation11 + $0x680] sm:$0xff]  ;;  %v660_v53 = vld [vmem:[#allocation11 + $0x790] sm:$0xff] }
 0x27b   :  { %1902 = vmatpush1.bf16.msra.mxu1 %v1901_v14  ;;  %v521_v14 = vld [vmem:[#allocation11 + $0x338] sm:$0xff]  ;;  %v667_v54 = vld [vmem:[#allocation11 + $0x7c8] sm:$0xff] }
 0x27c   :  { %1998 = vmatpush3.bf16.msra.mxu0 %v1997_v15  ;;  %1904 = vmatprep.subr.bf16.mxu1 %v1903_v16  ;;  %v528_v15 = vld [vmem:[#allocation11 + $0x370] sm:$0xff]  ;;  %v634_v16 = vld [vmem:[#allocation11 + $0x6c0] sm:$0xff] }
 0x27d   :  { %2000 = vmatprep.subr.bf16.mxu0 %v1999_v21  ;;  %v1923_v21 = vpack.c.bf16 %v528_v15, %v521_v14  ;;  %v2019_v26 = vpack.c.bf16 %v641_v17, %v634_v16  ;;  %v711_v14 = vld [vmem:[#allocation11 + $0x928] sm:$0xff]  ;;  %v605_v15 = vld [vmem:[#allocation11 + $0x5d8] sm:$0xff]  ;;  %v612_v16 = vld [vmem:[#allocation11 + $0x610] sm:$0xff] }
 0x27f   :  { %1906 = vmatpush1.bf16.msra.mxu1 %v1905_v28  ;;  %v535_v28 = vld [vmem:[#allocation11 + $0x3a8] sm:$0xff] }
 0x280   :  { %2002 = vmatpush3.bf16.msra.mxu0 %v2001_v29  ;;  %1908 = vmatprep.subr.bf16.mxu1 %v1907_v30  ;;  %v542_v29 = vld [vmem:[#allocation11 + $0x3e0] sm:$0xff]  ;;  %v1925_v30 = vpack.c.bf16 %v527_v23, %v520_v22  ;;  %v611_v22 = vld [vmem:[#allocation11 + $0x608] sm:$0xff] }
 0x281   :  { %2004 = vmatprep.subr.bf16.mxu0 %v2003_v33  ;;  %v1927_v31 = vpack.c.bf16 %v542_v29, %v535_v28  ;;  %v541_v33 = vld [vmem:[#allocation11 + $0x3d8] sm:$0xff]  ;;  %v718_v23 = vld [vmem:[#allocation11 + $0x960] sm:$0xff] }
 0x282   :  { %v1929_v38 = vpack.c.bf16 %v541_v33, %v534_v32  ;;  %v2039_v29 = vpack.c.bf16 %v725_v25, %v718_v23  ;;  %v732_v32 = vld [vmem:[#allocation11 + $0x9d0] sm:$0xff]  ;;  %v739_v33 = vld [vmem:[#allocation11 + $0xa08] sm:$0xff] }
 0x283   :  { %1910 = vmatpush1.bf16.msra.mxu1 %v1909_v39  ;;  %v2024_v39 = vpack.c.bf16 %v655_v35, %v648_v34  ;;  %v633_v34 = vld [vmem:[#allocation11 + $0x6b8] sm:$0xff]  ;;  %v640_v35 = vld [vmem:[#allocation11 + $0x6f0] sm:$0xff] }
 0x284   :  { %2006 = vmatpush3.bf16.msra.mxu0 %v2005_v40  ;;  %1912 = vmatprep.subr.bf16.mxu1 %v1911_v41  ;;  %v1931_v40 = vpack.c.bf16 %v556_v37, %v549_v36  ;;  %v548_v41 = vld [vmem:[#allocation11 + $0x410] sm:$0xff]  ;;  %v2042_v37 = vpack.c.bf16 %v739_v33, %v732_v32  ;;  %v751_v32 = vld [vmem:[#allocation11 + $0xa68] sm:$0xff] }
 0x285   :  { %2008 = vmatprep.subr.bf16.mxu0 %v2007_v45  ;;  %v563_v45 = vld [vmem:[#allocation11 + $0x488] sm:$0xff]  ;;  %v1933_v47 = vpack.c.bf16 %v555_v42, %v548_v41  ;;  %v746_v41 = vld [vmem:[#allocation11 + $0xa40] sm:$0xff]  ;;  %v753_v42 = vld [vmem:[#allocation11 + $0xa78] sm:$0xff] }
 0x286   :  { %v1935_v49 = vpack.c.bf16 %v570_v46, %v563_v45  ;;  %v2045_v46 = vpack.c.bf16 %v753_v42, %v746_v41 }
 0x287   :  { %1914 = vmatpush1.bf16.msra.mxu1 %v1913_v50  ;;  %v569_v50 = vld [vmem:[#allocation11 + $0x4b8] sm:$0xff] }
 0x288   :  { %2010 = vmatpush3.bf16.msra.mxu0 %v2009_v51  ;;  %1916 = vmatprep.subr.bf16.mxu1 %v1915_v52  ;;  %v676_v51 = vld [vmem:[#allocation11 + $0x810] sm:$0xff]  ;;  %v683_v52 = vld [vmem:[#allocation11 + $0x848] sm:$0xff]  ;;  %v1937_v59 = vpack.c.bf16 %v569_v50, %v562_v57  ;;  %v661_v57 = vld [vmem:[#allocation11 + $0x798] sm:$0xff] }
 0x289   :  { %2012 = vmatprep.subr.bf16.mxu0 %v2011_v60  ;;  %v2030_v60 = vpack.c.bf16 %v683_v52, %v676_v51  ;;  %v668_v50 = vld [vmem:[#allocation11 + $0x7d0] sm:$0xff] }
 0x28a   :  { %v1963_v52 = vpack.c.bf16 %v668_v50, %v661_v57 }
 0x28b   :  { %1918 = vmatpush1.bf16.msra.mxu1 %v1917_v5  ;;  %v591_v5 = vld [vmem:[#allocation11 + $0x568] sm:$0xff] }
 0x28c   :  { %2014 = vmatpush3.bf16.msra.mxu0 %v2013_v6  ;;  %1920 = vmatprep.subr.bf16.mxu1 %v1919_v7  ;;  %v598_v6 = vld [vmem:[#allocation11 + $0x5a0] sm:$0xff]  ;;  %v1941_v7 = vpack.c.bf16 %v583_v62, %v576_v63  ;;  %v681_v62 = vld [vmem:[#allocation11 + $0x838] sm:$0xff] }
 0x28d   :  { %2016 = vmatprep.subr.bf16.mxu0 %v2015_v11  ;;  %v1943_v9 = vpack.c.bf16 %v598_v6, %v591_v5  ;;  %v597_v11 = vld [vmem:[#allocation11 + $0x598] sm:$0xff]  ;;  %v1971_v6 = vpack.c.bf16 %v696_v4, %v689_v3  ;;  %v782_v4 = vsub.s32 6, %v2452_v55 }
 0x28e   :  { %v1945_v17 = vpack.c.bf16 %v597_v11, %v590_v10 }
 0x28f   :  { %1922 = vmatpush1.bf16.msra.mxu1 %v1921_v19  ;;  %v2036_v19 = vpack.c.bf16 %v711_v14, %v704_v12  ;;  %v702_v12 = vld [vmem:[#allocation11 + $0x8e0] sm:$0xff]  ;;  %v709_v14 = vld [vmem:[#allocation11 + $0x918] sm:$0xff] }
 0x290   :  { %2018 = vmatpush3.bf16.msra.mxu0 %v2017_v20  ;;  %1924 = vmatprep.subr.bf16.mxu1 %v1923_v21  ;;  %v1947_v20 = vpack.c.bf16 %v612_v16, %v605_v15  ;;  %v604_v21 = vld [vmem:[#allocation11 + $0x5d0] sm:$0xff]  ;;  %v717_v15 = vld [vmem:[#allocation11 + $0x958] sm:$0xff] }
 0x291   :  { %2020 = vmatprep.subr.bf16.mxu0 %v2019_v26  ;;  %v619_v26 = vld [vmem:[#allocation11 + $0x648] sm:$0xff]  ;;  %v1949_v28 = vpack.c.bf16 %v611_v22, %v604_v21  ;;  %v724_v16 = vld [vmem:[#allocation11 + $0x990] sm:$0xff]  ;;  %v738_v22 = vld [vmem:[#allocation11 + $0xa00] sm:$0xff] }
 0x292   :  { %v731_v21 = vld [vmem:[#allocation11 + $0x9c8] sm:$0xff] }
 0x293   :  { %1926 = vmatpush1.bf16.msra.mxu1 %v1925_v30  ;;  %v1951_v30 = vpack.c.bf16 %v626_v27, %v619_v26  ;;  %v1983_v25 = vpack.c.bf16 %v738_v22, %v731_v21  ;;  %v730_v26 = vld [vmem:[#allocation11 + $0x9c0] sm:$0xff]  ;;  %v737_v27 = vld [vmem:[#allocation11 + $0x9f8] sm:$0xff] }
 0x294   :  { %2022 = vmatpush3.bf16.msra.mxu0 %v2021_v13  ;;  %1928 = vmatprep.subr.bf16.mxu1 %v1927_v31  ;;  %v618_v13 = vld [vmem:[#allocation11 + $0x640] sm:$0xff]  ;;  %v625_v31 = vld [vmem:[#allocation11 + $0x678] sm:$0xff] }
 0x295   :  { %2023 = vmatprep.subr.bf16.mxu0 %v2303_v0  ;;  %v1953_v36 = vpack.c.bf16 %v625_v31, %v618_v13  ;;  %v744_v31 = vld [vmem:[#allocation11 + $0xa30] sm:$0xff] }
 0x296   :  { %v1989_v33 = vpack.c.bf16 %v751_v32, %v744_v31 }
 0x297   :  { %1282 = vmatmul.mubr.f32.vlgmr.msra.gmra.mrb[6].mxu0 %v2468_v18  ;;  %1930 = vmatpush1.bf16.msra.mxu1 %v1929_v38  ;;  %v1955_v38 = vpack.c.bf16 %v640_v35, %v633_v34  ;;  %v754_v34 = vld [vmem:[#allocation13] sm:$0xff]  ;;  %v770_v35 = vsub.s32 3, %v2452_v55 }
 0x298   :  { %2025 = vmatpush3.bf16.msra.mxu0 %v2024_v39  ;;  %1932 = vmatprep.subr.bf16.mxu1 %v1931_v40  ;;  %v632_v39 = vld [vmem:[#allocation11 + $0x6b0] sm:$0xff]  ;;  %v639_v40 = vld [vmem:[#allocation11 + $0x6e8] sm:$0xff] }
 0x299   :  { %2026 = vmatprep.subr.bf16.mxu0 %v2303_v0  ;;  %1620 = vmatprep.mubr.msk.f32.mxu0 %vm2304_vm0, %v2305_v1  ;;  %v1957_v45 = vpack.c.bf16 %v639_v40, %v632_v39  ;;  %v771_v39 = vrot.slane %v754_v34, %v770_v35 }
 0x29b   :  { %1934 = vmatpush1.bf16.msra.mxu1 %v1933_v47  ;;  %v1959_v47 = vpack.c.bf16 %v654_v44, %v647_v43 }
 0x29c   :  { %2028 = vmatpush3.bf16.msra.mxu0 %v2027_v48  ;;  %1936 = vmatprep.subr.bf16.mxu1 %v1935_v49  ;;  %v646_v48 = vld [vmem:[#allocation11 + $0x720] sm:$0xff]  ;;  %v653_v49 = vld [vmem:[#allocation11 + $0x758] sm:$0xff] }
 0x29d   :  { %2029 = vmatprep.subr.bf16.mxu0 %v2303_v0  ;;  %v1961_v51 = vpack.c.bf16 %v653_v49, %v646_v48 }
 0x29f   :  { %1938 = vmatpush1.bf16.msra.mxu1 %v1937_v59  ;;  %v675_v59 = vld [vmem:[#allocation11 + $0x808] sm:$0xff] }
 0x2a0   :  { %2031 = vmatpush3.bf16.msra.mxu0 %v2030_v60  ;;  %1940 = vmatprep.subr.bf16.mxu1 %v1939_v61  ;;  %v682_v60 = vld [vmem:[#allocation11 + $0x840] sm:$0xff]  ;;  %v1965_v61 = vpack.c.bf16 %v667_v54, %v660_v53 }
 0x2a1   :  { %2032 = vmatprep.subr.bf16.mxu0 %v2303_v0  ;;  %v1967_v63 = vpack.c.bf16 %v682_v60, %v675_v59 }
 0x2a3   :  { %1942 = vmatpush1.bf16.msra.mxu1 %v1941_v7  ;;  %v688_v7 = vld [vmem:[#allocation11 + $0x870] sm:$0xff] }
 0x2a4   :  { %2034 = vmatpush3.bf16.msra.mxu0 %v2033_v8  ;;  %1944 = vmatprep.subr.bf16.mxu1 %v1943_v9  ;;  %v695_v8 = vld [vmem:[#allocation11 + $0x8a8] sm:$0xff] }
 0x2a5   :  { %2035 = vmatprep.subr.bf16.mxu0 %v2303_v0  ;;  %v703_v9 = vld [vmem:[#allocation11 + $0x8e8] sm:$0xff]  ;;  %v1973_v10 = vpack.c.bf16 %v695_v8, %v688_v7 }
 0x2a7   :  { %1946 = vmatpush1.bf16.msra.mxu1 %v1945_v17  ;;  %v1979_v17 = vpack.c.bf16 %v724_v16, %v717_v15 }
 0x2a8   :  { %2037 = vmatpush3.bf16.msra.mxu0 %v2036_v19  ;;  %1948 = vmatprep.subr.bf16.mxu1 %v1947_v20  ;;  %v716_v19 = vld [vmem:[#allocation11 + $0x950] sm:$0xff]  ;;  %v723_v20 = vld [vmem:[#allocation11 + $0x988] sm:$0xff] }
 0x2a9   :  { %2038 = vmatprep.subr.bf16.mxu0 %v2303_v0  ;;  %v1981_v23 = vpack.c.bf16 %v723_v20, %v716_v19 }
 0x2ab   :  { %1950 = vmatpush1.bf16.msra.mxu1 %v1949_v28  ;;  %v745_v28 = vld [vmem:[#allocation11 + $0xa38] sm:$0xff] }
 0x2ac   :  { %2040 = vmatpush3.bf16.msra.mxu0 %v2039_v29  ;;  %1952 = vmatprep.subr.bf16.mxu1 %v1951_v30  ;;  %v752_v29 = vld [vmem:[#allocation11 + $0xa70] sm:$0xff]  ;;  %v1985_v30 = vpack.c.bf16 %v737_v27, %v730_v26 }
 0x2ad   :  { %2041 = vmatprep.subr.bf16.mxu0 %v2303_v0  ;;  %v1987_v13 = vpack.c.bf16 %v752_v29, %v745_v28 }
 0x2af   :  { %1954 = vmatpush1.bf16.msra.mxu1 %v1953_v36  ;;  %v759_v36 = vrot.slane %v754_v34, %v261_v56 }
 0x2b0   :  { %2043 = vmatpush3.bf16.msra.mxu0 %v2042_v37  ;;  %1956 = vmatprep.subr.bf16.mxu1 %v1955_v38  ;;  %v767_v37 = vrot.slane %v754_v34, %v269_v24  ;;  %v763_v38 = vrot.slane %v754_v34, %v265_v58 }
 0x2b1   :  { %2044 = vmatprep.subr.bf16.mxu0 %v2303_v0  ;;  %v674_v0 = vld [vmem:[#allocation11 + $0x800] sm:$0xff] }
 0x2b2   :  { %v1969_v5 = vpack.c.bf16 %v681_v62, %v674_v0 }
 0x2b3   :  { %1958 = vmatpush1.bf16.msra.mxu1 %v1957_v45 }
 0x2b4   :  { %2046 = vmatpush3.bf16.msra.mxu0 %v2045_v46  ;;  %1960 = vmatprep.subr.bf16.mxu1 %v1959_v47 }
 0x2b6   :  { %1140 = vmatmul.mubr.f32.vlgmr.msra.gmra.mrb[4].mxu1 %v2468_v18  ;;  %v710_v18 = vld [vmem:[#allocation11 + $0x920] sm:$0xff] }
 0x2b7   :  { %1621 = vmatmul.mubr.f32.vlgmr.msra.gmra.mrb[8].mxu0 %v2481_v2  ;;  %1962 = vmatpush1.bf16.msra.mxu1 %v1961_v51  ;;  %v1975_v11 = vpack.c.bf16 %v710_v18, %v703_v9 }
 0x2b8   :  { %1964 = vmatprep.subr.bf16.mxu1 %v1963_v52  ;;  %1210 = vmatprep.mubr.f32.mxu1 %v2305_v1  ;;  %v1977_v1 = vpack.c.bf16 %v709_v14, %v702_v12  ;;  %v774_v12 = vsub.s32 4, %v2452_v55  ;;  %v778_v14 = vsub.s32 5, %v2452_v55 }
 0x2ba   :  { %v775_v16 = vrot.slane %v754_v34, %v774_v12 }
 0x2bb   :  { %1966 = vmatpush1.bf16.msra.mxu1 %v1965_v61 }
 0x2bc   :  { %1968 = vmatprep.subr.bf16.mxu1 %v1967_v63 }
 0x2bf   :  { %1970 = vmatpush1.bf16.msra.mxu1 %v1969_v5  ;;  %v783_v5 = vrot.slane %v754_v34, %v782_v4 }
 0x2c0   :  { %1972 = vmatprep.subr.bf16.mxu1 %v1971_v6 }
 0x2c3   :  { %1974 = vmatpush1.bf16.msra.mxu1 %v1973_v10 }
 0x2c4   :  { %1976 = vmatprep.subr.bf16.mxu1 %v1975_v11 }
 0x2c7   :  { %1978 = vmatpush1.bf16.msra.mxu1 %v1977_v1  ;;  %v779_v1 = vrot.slane %v754_v34, %v778_v14 }
 0x2c8   :  { %1980 = vmatprep.subr.bf16.mxu1 %v1979_v17 }
 0x2cb   :  { %1982 = vmatpush1.bf16.msra.mxu1 %v1981_v23 }
 0x2cc   :  { %1984 = vmatprep.subr.bf16.mxu1 %v1983_v25 }
 0x2cf   :  { %1986 = vmatpush1.bf16.msra.mxu1 %v1985_v30 }
 0x2d0   :  { %1988 = vmatprep.subr.bf16.mxu1 %v1987_v13 }
 0x2d3   :  { %1990 = vmatpush1.bf16.msra.mxu1 %v1989_v33 }
 0x2d6   :  { %1211 = vmatmul.mubr.f32.vlgmr.msra.gmra.mrb[4].mxu1 %v2481_v2 }
 0x349   :  { %v928_v40 = vpop.f32.mrb[2].mxu1  ;;  %v1070_v41 = vpop.f32.mrb[4].mxu0 }
 0x34a   :  { %v2047_v42 = vadd.f32 %v928_v40, %v759_v36  ;;  %v2049_v43 = vadd.f32 %v1070_v41, %v767_v37  ;;  %v930_v44 = vpop.f32.mrb[3].mxu1  ;;  %v1072_v45 = vpop.f32.mrb[5].mxu0 }
 0x34b   :  { %v2048_v2 = vadd.f32 %v930_v44, %v763_v38  ;;  %v2050_v46 = vadd.f32 %v1072_v45, %v771_v39 }
 0x34c   :  { %v1425_v47 = vmul.f32 -1.442695, %v2047_v42  ;;  %v1427_v48 = vmul.f32 -1.442695, %v2049_v43 }
 0x34d   :  { %v1426_v49 = vmul.f32 -1.442695, %v2048_v2  ;;  %v1428_v57 = vmul.f32 -1.442695, %v2050_v46 }
 0x34e   :  { %2076 = vpow2.f32 %v1425_v47 }
 0x34f   :  { %2078 = vpow2.f32 %v1427_v48 }
 0x350   :  { %2080 = vpow2.f32 %v1426_v49 }
 0x351   :  { %2082 = vpow2.f32 %v1428_v57 }
 0x358   :  { %v2077_v56 = vpop.eup %2076 }
 0x359   :  { %v2079_v24 = vpop.eup %2078  ;;  %v1378_v58 = vadd.f32 1.0, %v2077_v56 }
 0x35a   :  { %v2081_v50 = vpop.eup %2080  ;;  %v1380_v51 = vadd.f32 1.0, %v2079_v24 }
 0x35b   :  { %v2083_v52 = vpop.eup %2082  ;;  %2084 = vrcp.f32 %v1378_v58  ;;  %v1379_v53 = vadd.f32 1.0, %v2081_v50 }
 0x35c   :  { %2086 = vrcp.f32 %v1380_v51  ;;  %v1381_v54 = vadd.f32 1.0, %v2083_v52 }
 0x35d   :  { %2088 = vrcp.f32 %v1379_v53 }
 0x35e   :  { %2090 = vrcp.f32 %v1381_v54 }
 0x365   :  { %v2085_v59 = vpop.eup %2084 }
 0x366   :  { %v2087_v60 = vpop.eup %2086  ;;  %1399 = vst [vmem:[#allocation14] sm:$0xff] %v2085_v59 }
 0x367   :  { %v2089_v61 = vpop.eup %2088  ;;  %1401 = vst [vmem:[#allocation14 + $0x10] sm:$0xff] %v2087_v60 }
 0x368   :  { %v2091_v63 = vpop.eup %2090  ;;  %1400 = vst [vmem:[#allocation14 + $0x8] sm:$0xff] %v2089_v61 }
 0x369   :  { %1402 = vst [vmem:[#allocation14 + $0x18] sm:$0xff] %v2091_v63 }
 0x36a   :  { %v1498_v0 = vpop.f32.mrb[6].mxu0 }
 0x36b   :  { %v1499_v62 = vpop.f32.mrb[7].mxu0 }
 0x36c   :  { %v1500_v3 = vadd.f32 %v1499_v62, %v1498_v0 }
 0x36e   :  { %v1284_v6 = vadd.f32 %v1500_v3, %v783_v5 }
 0x38a   :  { %v1353_v7 = vpop.f32.mrb[8].mxu0 }
 0x38b   :  { %v1354_v8 = vadd.f32 %v1353_v7, %v1284_v6  ;;  %v1622_v9 = vpop.f32.mrb[9].mxu0 }
 0x38d   :  { %v1431_v18 = vmul.f32 -1.442695, %v1354_v8 }
 0x38f   :  { %2092 = vpow2.f32 %v1431_v18 }
 0x399   :  { %v2093_v10 = vpop.eup %2092 }
 0x39a   :  { %v1384_v11 = vadd.f32 1.0, %v2093_v10 }
 0x39c   :  { %2094 = vrcp.f32 %v1384_v11 }
 0x3a6   :  { %v2095_v15 = vpop.eup %2094 }
 0x3a7   :  { %1405 = vst [vmem:[#allocation14 + $0x30] sm:$0xff] %v2095_v15 }
 0x3a9   :  { %v1212_v17 = vpop.f32.mrb[4].mxu1 }
 0x3aa   :  { %v2051_v19 = vadd.f32 %v1212_v17, %v775_v16  ;;  %v1214_v20 = vpop.f32.mrb[5].mxu1 }
 0x3ab   :  { %v2052_v21 = vadd.f32 %v1214_v20, %v779_v1 }
 0x3ac   :  { %v1429_v22 = vmul.f32 -1.442695, %v2051_v19 }
 0x3ad   :  { %v1430_v23 = vmul.f32 -1.442695, %v2052_v21 }
 0x3ae   :  { %2096 = vpow2.f32 %v1429_v22 }
 0x3af   :  { %2098 = vpow2.f32 %v1430_v23 }
 0x3b8   :  { %v2097_v25 = vpop.eup %2096 }
 0x3b9   :  { %v2099_v26 = vpop.eup %2098  ;;  %v1382_v27 = vadd.f32 1.0, %v2097_v25 }
 0x3ba   :  { %v1383_v28 = vadd.f32 1.0, %v2099_v26 }
 0x3bb   :  { %2100 = vrcp.f32 %v1382_v27 }
 0x3bc   :  { %2102 = vrcp.f32 %v1383_v28 }
 0x3c5   :  { %v2101_v55 = vpop.eup %2100 }
 0x3c6   :  { %v2103_v29 = vpop.eup %2102  ;;  %1403 = vst [vmem:[#allocation14 + $0x20] sm:$0xff] %v2101_v55 }
 0x3c7   :  { %1404 = vst [vmem:[#allocation14 + $0x28] sm:$0xff] %v2103_v29 }
 0x3c8   :  { %2269 = shalt.err (!%p2266_p4)
}
 0x3c9   :  { %s2270_s17 = scalar_lea.hbm %s2531_s7, 896 }
 0x3ca   :  { %p2271_p5 = scmp.ne.s32.totalorder %s2531_s7, %s2270_s17  ;;  %p2274_p6 = scmp.lt.u32.totalorder %s2270_s17, %s2531_s7 }
 0x3cc   :  { %p2276_p7 = pnand %p2274_p6, %p2271_p5 }
 0x3ce   :  { %2279 = shalt.err (!%p2276_p7)
}
 0x3cf   :  { %1415 = dma.vmem_to_hbm [thread:$0]  %s1413_s3, 896, %s2531_s7, [#allocation4]  }
 0x3d0   :  { %2288 = dma.done.wait [#allocation4], 896  }
 0x3d1   :  { %2289 = vsyncadd [#allocation4], 4294966400 }
 0x3d2   :  { %1419 = vsyncpa [#allocation3], 1 }
 0x3d3   :  { %1420 = vsyncpa [#allocation6], 1 }
 0x3d4   :  { %1421 = vsyncpa [#allocation9], 1 }
 0x3d5   :  { %1422 = vsyncpa [#allocation12], 1 }
 0x3d6   :  { %1423 = vsyncpa [#allocation4], 1 }

</bundles_post_ra>
